<compile_context>
chip_gen: v5e
topology: v5e:2x2
jax: 0.10.0
libtpu: 0.0.40
codegen_flags: <defaults>
</compile_context>

<pallas_src>
import jax
import jax.numpy as jnp
from jax import lax
from jax.experimental import pallas as pl
from jax.experimental.pallas import tpu as pltpu


def _make_kernel(C, Wp, HWp):
    """Kernel specialized (fully unrolled at trace time) for C / Wp / HWp."""
    NPQ = 4 * C        # (phase dy, phase dx, out-channel) rows
    def kernel(w_ref, b_ref, x_ref, o_ref):
        # w_ref: (4C, 9C) f32 VMEM. Column k = (ci*3 + r)*3 + c holds the mixing
        #        weights of shifted view (r, c) of input channel ci for every
        #        output row (phase, co).
        # b_ref: (4C, 1)  f32 VMEM. Bias per output row.
        # x_ref: (C, Lp)  f32 VMEM. Zero-padded input of the current batch
        #        element, flattened row-major with row stride Wp = W + 2.
        # o_ref: (4C, HWp) f32 VMEM. HWp = H * Wp; columns >= W of each logical
        #        row are junk and get sliced away by the wrapper.
        acc = jnp.broadcast_to(b_ref[...], (NPQ, HWp))
        for ci in range(C):
            for r in range(3):
                for c in range(3):
                    k = (ci * 3 + r) * 3 + c
                    off = r * Wp + c
                    # Shifted view: a single static contiguous slice (lane-dense).
                    trow = x_ref[pl.ds(ci, 1), pl.ds(off, HWp)]   # (1, HWp)
                    wcol = w_ref[:, pl.ds(k, 1)]                  # (4C, 1)
                    acc = acc + wcol * trow                       # (4C, HWp) FMA
        o_ref[...] = acc
    return kernel


def upsample_forward(x, weight, bias):
    """Equivalent of Upsample.forward: F.interpolate(scale=2,'nearest') -> Conv2d(C,C,3,pad=1).

    x:      (N, C, H, W) float32 (NCHW)
    weight: (C, C, 3, 3) float32 (OIHW)
    bias:   (C,)         float32
    returns (N, C, 2H, 2W) float32
    """
    N, C, H, W = x.shape
    f32 = jnp.float32
    Hp, Wp = H + 2, W + 2
    HWp = H * Wp
    # Largest read = max_offset + HWp = (2*Wp + 2) + H*Wp; round to full lane groups.
    Lp = pl.cdiv(HWp + 2 * Wp + 2, 128) * 128

    # Zero-pad the ORIGINAL-resolution input by 1 and flatten row-major: the zero
    # border makes every shifted view a plain contiguous slice (no masking needed).
    x_pad = jnp.pad(x.astype(f32), ((0, 0), (0, 0), (1, 1), (1, 1)))   # (N,C,Hp,Wp)
    x_flat = x_pad.reshape(N, C, Hp * Wp)
    x_flat = jnp.pad(x_flat, ((0, 0), (0, 0), (0, Lp - Hp * Wp)))      # (N,C,Lp)

    # Collapse "3x3 conv on nearest-x2 upsample" onto the original grid:
    #   out[co, 2i+di, 2j+dj] = b[co] + sum_{ci,r,c} W3[di,dj,co,ci,r,c] * x_pad[ci, i+r, j+c]
    # A[di, r, kh] = 1 if conv row-tap kh reads padded-input row offset r for phase di.
    A = jnp.array([[[1., 0., 0.], [0., 1., 1.], [0., 0., 0.]],
                   [[0., 0., 0.], [1., 1., 0.], [0., 0., 1.]]], dtype=f32)   # (2, r, kh)
    W3 = jnp.einsum('prh,qcw,oihw->pqoirc', A, A, weight.astype(f32))        # (2,2,Co,Ci,3,3)
    # Rows ordered (di*2+dj)*C + co ; columns ordered (ci*3+r)*3 + c.
    w_mat = W3.transpose(3, 4, 5, 0, 1, 2).reshape(9 * C, 4 * C).T           # (4C, 9C)
    b_col = jnp.tile(bias.astype(f32), 4).reshape(4 * C, 1)                  # (4C, 1)

    kernel = _make_kernel(C, Wp, HWp)
    out_flat = pl.pallas_call(
        kernel,
        out_shape=jax.ShapeDtypeStruct((N, 4 * C, HWp), f32),
        grid_spec=pltpu.PrefetchScalarGridSpec(
            num_scalar_prefetch=0,
            grid=(N,),                                   # one step per batch element
            in_specs=[
                pl.BlockSpec((4 * C, 9 * C), lambda n: (0, 0)),        # weights (VMEM)
                pl.BlockSpec((4 * C, 1), lambda n: (0, 0)),            # bias    (VMEM)
                pl.BlockSpec((None, C, Lp), lambda n: (n, 0, 0)),      # flat padded x
            ],
            out_specs=pl.BlockSpec((None, 4 * C, HWp), lambda n: (n, 0, 0)),
        ),
        compiler_params=pltpu.CompilerParams(
            dimension_semantics=("parallel",)),          # >=2 blocks for v7x megacore
    )(w_mat, b_col, x_flat)

    # (N, 4C, H*Wp) -> (N, di, dj, C, H, W) -> interleave phases -> (N, C, 2H, 2W).
    out6 = out_flat.reshape(N, 2, 2, C, H, Wp)[..., :W]
    out = out6.transpose(0, 3, 4, 1, 5, 2).reshape(N, C, 2 * H, 2 * W)
    return out


def _reference(x, weight, bias):
    x_up = jnp.repeat(jnp.repeat(x, 2, axis=2), 2, axis=3)
    out = lax.conv_general_dilated(
        x_up, weight, window_strides=(1, 1), padding=((1, 1), (1, 1)),
        dimension_numbers=('NCHW', 'OIHW', 'NCHW'))
    return out + bias.reshape(1, -1, 1, 1)


if __name__ == "__main__":
    key = jax.random.PRNGKey(0)
    kx, kw, kb = jax.random.split(key, 3)
    N, C, H, W = 2, 4, 16, 16
    x = jax.random.normal(kx, (N, C, H, W), dtype=jnp.float32)

    # Deterministic Conv2d-style init (uniform in +/- 1/sqrt(fan_in)).
    fan_in = C * 3 * 3
    bound = 1.0 / (fan_in ** 0.5)
    weight = jax.random.uniform(kw, (C, C, 3, 3), minval=-bound, maxval=bound,
                                dtype=jnp.float32)
    bias = jax.random.uniform(kb, (C,), minval=-bound, maxval=bound,
                              dtype=jnp.float32)

    fwd = jax.jit(upsample_forward)
    out = jax.block_until_ready(fwd(x, weight, bias))

    ref = _reference(x, weight, bias)
    assert out.shape == (N, C, 2 * H, 2 * W)
    err = float(jnp.max(jnp.abs(out - ref)))
    assert jnp.allclose(out, ref, atol=1e-4, rtol=1e-4), err
    print("KERNEL_OK")
</pallas_src>

<mosaic_0001>
module attributes {stable_mosaic.version = 11 : i64} {
  func.func @kernel(%arg0: i32, %arg1: memref<16x36xf32, #tpu.memory_space<vmem>>, %arg2: memref<16x1xf32, #tpu.memory_space<vmem>>, %arg3: memref<1x4x384xf32, #tpu.memory_space<vmem>>, %arg4: memref<1x16x288xf32, #tpu.memory_space<vmem>>) attributes {dimension_semantics = [#tpu.dimension_semantics<parallel>], iteration_bounds = array<i64: 2>, scalar_prefetch = 0 : i64, scratch_operands = 0 : i64, tpu.core_type = #tpu.core_type<tc>, window_params = [{pipeline_mode = #tpu.pipeline_mode<synchronous>, transform_indices = @transform_0, window_bounds = array<i64: 16, 36>}, {pipeline_mode = #tpu.pipeline_mode<synchronous>, transform_indices = @transform_1, window_bounds = array<i64: 16, 1>}, {transform_indices = @transform_2, window_bounds = array<i64: 1, 4, 384>}, {transform_indices = @transform_3, window_bounds = array<i64: 1, 16, 288>}]} {
    %c0 = arith.constant 0 : index
    %c0_0 = arith.constant 0 : index
    %0 = vector.load %arg2[%c0, %c0_0] : memref<16x1xf32, #tpu.memory_space<vmem>>, vector<16x1xf32>
    %1 = vector.shape_cast %0 : vector<16x1xf32> to vector<16x1xf32>
    %2 = vector.broadcast %1 : vector<16x1xf32> to vector<16x288xf32>
    %c0_1 = arith.constant 0 : index
    %c0_2 = arith.constant 0 : index
    %c0_3 = arith.constant 0 : index
    %3 = vector.load %arg3[%c0_1, %c0_2, %c0_3] : memref<1x4x384xf32, #tpu.memory_space<vmem>>, vector<1x1x288xf32>
    %4 = vector.shape_cast %3 : vector<1x1x288xf32> to vector<1x288xf32>
    %c0_4 = arith.constant 0 : index
    %c0_5 = arith.constant 0 : index
    %5 = vector.load %arg1[%c0_4, %c0_5] : memref<16x36xf32, #tpu.memory_space<vmem>>, vector<16x1xf32>
    %6 = vector.broadcast %5 : vector<16x1xf32> to vector<16x288xf32>
    %7 = vector.broadcast %4 : vector<1x288xf32> to vector<16x288xf32>
    %8 = arith.mulf %6, %7 : vector<16x288xf32>
    %9 = arith.addf %2, %8 : vector<16x288xf32>
    %c0_6 = arith.constant 0 : index
    %c0_7 = arith.constant 0 : index
    %c1 = arith.constant 1 : index
    %10 = vector.load %arg3[%c0_6, %c0_7, %c1] : memref<1x4x384xf32, #tpu.memory_space<vmem>>, vector<1x1x288xf32>
    %11 = vector.shape_cast %10 : vector<1x1x288xf32> to vector<1x288xf32>
    %c0_8 = arith.constant 0 : index
    %c1_9 = arith.constant 1 : index
    %12 = vector.load %arg1[%c0_8, %c1_9] : memref<16x36xf32, #tpu.memory_space<vmem>>, vector<16x1xf32>
    %13 = vector.broadcast %12 : vector<16x1xf32> to vector<16x288xf32>
    %14 = vector.broadcast %11 : vector<1x288xf32> to vector<16x288xf32>
    %15 = arith.mulf %13, %14 : vector<16x288xf32>
    %16 = arith.addf %9, %15 : vector<16x288xf32>
    %c0_10 = arith.constant 0 : index
    %c0_11 = arith.constant 0 : index
    %c2 = arith.constant 2 : index
    %17 = vector.load %arg3[%c0_10, %c0_11, %c2] : memref<1x4x384xf32, #tpu.memory_space<vmem>>, vector<1x1x288xf32>
    %18 = vector.shape_cast %17 : vector<1x1x288xf32> to vector<1x288xf32>
    %c0_12 = arith.constant 0 : index
    %c2_13 = arith.constant 2 : index
    %19 = vector.load %arg1[%c0_12, %c2_13] : memref<16x36xf32, #tpu.memory_space<vmem>>, vector<16x1xf32>
    %20 = vector.broadcast %19 : vector<16x1xf32> to vector<16x288xf32>
    %21 = vector.broadcast %18 : vector<1x288xf32> to vector<16x288xf32>
    %22 = arith.mulf %20, %21 : vector<16x288xf32>
    %23 = arith.addf %16, %22 : vector<16x288xf32>
    %c0_14 = arith.constant 0 : index
    %c0_15 = arith.constant 0 : index
    %c18 = arith.constant 18 : index
    %24 = vector.load %arg3[%c0_14, %c0_15, %c18] : memref<1x4x384xf32, #tpu.memory_space<vmem>>, vector<1x1x288xf32>
    %25 = vector.shape_cast %24 : vector<1x1x288xf32> to vector<1x288xf32>
    %c0_16 = arith.constant 0 : index
    %c3 = arith.constant 3 : index
    %26 = vector.load %arg1[%c0_16, %c3] : memref<16x36xf32, #tpu.memory_space<vmem>>, vector<16x1xf32>
    %27 = vector.broadcast %26 : vector<16x1xf32> to vector<16x288xf32>
    %28 = vector.broadcast %25 : vector<1x288xf32> to vector<16x288xf32>
    %29 = arith.mulf %27, %28 : vector<16x288xf32>
    %30 = arith.addf %23, %29 : vector<16x288xf32>
    %c0_17 = arith.constant 0 : index
    %c0_18 = arith.constant 0 : index
    %c19 = arith.constant 19 : index
    %31 = vector.load %arg3[%c0_17, %c0_18, %c19] : memref<1x4x384xf32, #tpu.memory_space<vmem>>, vector<1x1x288xf32>
    %32 = vector.shape_cast %31 : vector<1x1x288xf32> to vector<1x288xf32>
    %c0_19 = arith.constant 0 : index
    %c4 = arith.constant 4 : index
    %33 = vector.load %arg1[%c0_19, %c4] : memref<16x36xf32, #tpu.memory_space<vmem>>, vector<16x1xf32>
    %34 = vector.broadcast %33 : vector<16x1xf32> to vector<16x288xf32>
    %35 = vector.broadcast %32 : vector<1x288xf32> to vector<16x288xf32>
    %36 = arith.mulf %34, %35 : vector<16x288xf32>
    %37 = arith.addf %30, %36 : vector<16x288xf32>
    %c0_20 = arith.constant 0 : index
    %c0_21 = arith.constant 0 : index
    %c20 = arith.constant 20 : index
    %38 = vector.load %arg3[%c0_20, %c0_21, %c20] : memref<1x4x384xf32, #tpu.memory_space<vmem>>, vector<1x1x288xf32>
    %39 = vector.shape_cast %38 : vector<1x1x288xf32> to vector<1x288xf32>
    %c0_22 = arith.constant 0 : index
    %c5 = arith.constant 5 : index
    %40 = vector.load %arg1[%c0_22, %c5] : memref<16x36xf32, #tpu.memory_space<vmem>>, vector<16x1xf32>
    %41 = vector.broadcast %40 : vector<16x1xf32> to vector<16x288xf32>
    %42 = vector.broadcast %39 : vector<1x288xf32> to vector<16x288xf32>
    %43 = arith.mulf %41, %42 : vector<16x288xf32>
    %44 = arith.addf %37, %43 : vector<16x288xf32>
    %c0_23 = arith.constant 0 : index
    %c0_24 = arith.constant 0 : index
    %c36 = arith.constant 36 : index
    %45 = vector.load %arg3[%c0_23, %c0_24, %c36] : memref<1x4x384xf32, #tpu.memory_space<vmem>>, vector<1x1x288xf32>
    %46 = vector.shape_cast %45 : vector<1x1x288xf32> to vector<1x288xf32>
    %c0_25 = arith.constant 0 : index
    %c6 = arith.constant 6 : index
    %47 = vector.load %arg1[%c0_25, %c6] : memref<16x36xf32, #tpu.memory_space<vmem>>, vector<16x1xf32>
    %48 = vector.broadcast %47 : vector<16x1xf32> to vector<16x288xf32>
    %49 = vector.broadcast %46 : vector<1x288xf32> to vector<16x288xf32>
    %50 = arith.mulf %48, %49 : vector<16x288xf32>
    %51 = arith.addf %44, %50 : vector<16x288xf32>
    %c0_26 = arith.constant 0 : index
    %c0_27 = arith.constant 0 : index
    %c37 = arith.constant 37 : index
    %52 = vector.load %arg3[%c0_26, %c0_27, %c37] : memref<1x4x384xf32, #tpu.memory_space<vmem>>, vector<1x1x288xf32>
    %53 = vector.shape_cast %52 : vector<1x1x288xf32> to vector<1x288xf32>
    %c0_28 = arith.constant 0 : index
    %c7 = arith.constant 7 : index
    %54 = vector.load %arg1[%c0_28, %c7] : memref<16x36xf32, #tpu.memory_space<vmem>>, vector<16x1xf32>
    %55 = vector.broadcast %54 : vector<16x1xf32> to vector<16x288xf32>
    %56 = vector.broadcast %53 : vector<1x288xf32> to vector<16x288xf32>
    %57 = arith.mulf %55, %56 : vector<16x288xf32>
    %58 = arith.addf %51, %57 : vector<16x288xf32>
    %c0_29 = arith.constant 0 : index
    %c0_30 = arith.constant 0 : index
    %c38 = arith.constant 38 : index
    %59 = vector.load %arg3[%c0_29, %c0_30, %c38] : memref<1x4x384xf32, #tpu.memory_space<vmem>>, vector<1x1x288xf32>
    %60 = vector.shape_cast %59 : vector<1x1x288xf32> to vector<1x288xf32>
    %c0_31 = arith.constant 0 : index
    %c8 = arith.constant 8 : index
    %61 = vector.load %arg1[%c0_31, %c8] : memref<16x36xf32, #tpu.memory_space<vmem>>, vector<16x1xf32>
    %62 = vector.broadcast %61 : vector<16x1xf32> to vector<16x288xf32>
    %63 = vector.broadcast %60 : vector<1x288xf32> to vector<16x288xf32>
    %64 = arith.mulf %62, %63 : vector<16x288xf32>
    %65 = arith.addf %58, %64 : vector<16x288xf32>
    %c0_32 = arith.constant 0 : index
    %c1_33 = arith.constant 1 : index
    %c0_34 = arith.constant 0 : index
    %66 = vector.load %arg3[%c0_32, %c1_33, %c0_34] : memref<1x4x384xf32, #tpu.memory_space<vmem>>, vector<1x1x288xf32>
    %67 = vector.shape_cast %66 : vector<1x1x288xf32> to vector<1x288xf32>
    %c0_35 = arith.constant 0 : index
    %c9 = arith.constant 9 : index
    %68 = vector.load %arg1[%c0_35, %c9] : memref<16x36xf32, #tpu.memory_space<vmem>>, vector<16x1xf32>
    %69 = vector.broadcast %68 : vector<16x1xf32> to vector<16x288xf32>
    %70 = vector.broadcast %67 : vector<1x288xf32> to vector<16x288xf32>
    %71 = arith.mulf %69, %70 : vector<16x288xf32>
    %72 = arith.addf %65, %71 : vector<16x288xf32>
    %c0_36 = arith.constant 0 : index
    %c1_37 = arith.constant 1 : index
    %c1_38 = arith.constant 1 : index
    %73 = vector.load %arg3[%c0_36, %c1_37, %c1_38] : memref<1x4x384xf32, #tpu.memory_space<vmem>>, vector<1x1x288xf32>
    %74 = vector.shape_cast %73 : vector<1x1x288xf32> to vector<1x288xf32>
    %c0_39 = arith.constant 0 : index
    %c10 = arith.constant 10 : index
    %75 = vector.load %arg1[%c0_39, %c10] : memref<16x36xf32, #tpu.memory_space<vmem>>, vector<16x1xf32>
    %76 = vector.broadcast %75 : vector<16x1xf32> to vector<16x288xf32>
    %77 = vector.broadcast %74 : vector<1x288xf32> to vector<16x288xf32>
    %78 = arith.mulf %76, %77 : vector<16x288xf32>
    %79 = arith.addf %72, %78 : vector<16x288xf32>
    %c0_40 = arith.constant 0 : index
    %c1_41 = arith.constant 1 : index
    %c2_42 = arith.constant 2 : index
    %80 = vector.load %arg3[%c0_40, %c1_41, %c2_42] : memref<1x4x384xf32, #tpu.memory_space<vmem>>, vector<1x1x288xf32>
    %81 = vector.shape_cast %80 : vector<1x1x288xf32> to vector<1x288xf32>
    %c0_43 = arith.constant 0 : index
    %c11 = arith.constant 11 : index
    %82 = vector.load %arg1[%c0_43, %c11] : memref<16x36xf32, #tpu.memory_space<vmem>>, vector<16x1xf32>
    %83 = vector.broadcast %82 : vector<16x1xf32> to vector<16x288xf32>
    %84 = vector.broadcast %81 : vector<1x288xf32> to vector<16x288xf32>
    %85 = arith.mulf %83, %84 : vector<16x288xf32>
    %86 = arith.addf %79, %85 : vector<16x288xf32>
    %c0_44 = arith.constant 0 : index
    %c1_45 = arith.constant 1 : index
    %c18_46 = arith.constant 18 : index
    %87 = vector.load %arg3[%c0_44, %c1_45, %c18_46] : memref<1x4x384xf32, #tpu.memory_space<vmem>>, vector<1x1x288xf32>
    %88 = vector.shape_cast %87 : vector<1x1x288xf32> to vector<1x288xf32>
    %c0_47 = arith.constant 0 : index
    %c12 = arith.constant 12 : index
    %89 = vector.load %arg1[%c0_47, %c12] : memref<16x36xf32, #tpu.memory_space<vmem>>, vector<16x1xf32>
    %90 = vector.broadcast %89 : vector<16x1xf32> to vector<16x288xf32>
    %91 = vector.broadcast %88 : vector<1x288xf32> to vector<16x288xf32>
    %92 = arith.mulf %90, %91 : vector<16x288xf32>
    %93 = arith.addf %86, %92 : vector<16x288xf32>
    %c0_48 = arith.constant 0 : index
    %c1_49 = arith.constant 1 : index
    %c19_50 = arith.constant 19 : index
    %94 = vector.load %arg3[%c0_48, %c1_49, %c19_50] : memref<1x4x384xf32, #tpu.memory_space<vmem>>, vector<1x1x288xf32>
    %95 = vector.shape_cast %94 : vector<1x1x288xf32> to vector<1x288xf32>
    %c0_51 = arith.constant 0 : index
    %c13 = arith.constant 13 : index
    %96 = vector.load %arg1[%c0_51, %c13] : memref<16x36xf32, #tpu.memory_space<vmem>>, vector<16x1xf32>
    %97 = vector.broadcast %96 : vector<16x1xf32> to vector<16x288xf32>
    %98 = vector.broadcast %95 : vector<1x288xf32> to vector<16x288xf32>
    %99 = arith.mulf %97, %98 : vector<16x288xf32>
    %100 = arith.addf %93, %99 : vector<16x288xf32>
    %c0_52 = arith.constant 0 : index
    %c1_53 = arith.constant 1 : index
    %c20_54 = arith.constant 20 : index
    %101 = vector.load %arg3[%c0_52, %c1_53, %c20_54] : memref<1x4x384xf32, #tpu.memory_space<vmem>>, vector<1x1x288xf32>
    %102 = vector.shape_cast %101 : vector<1x1x288xf32> to vector<1x288xf32>
    %c0_55 = arith.constant 0 : index
    %c14 = arith.constant 14 : index
    %103 = vector.load %arg1[%c0_55, %c14] : memref<16x36xf32, #tpu.memory_space<vmem>>, vector<16x1xf32>
    %104 = vector.broadcast %103 : vector<16x1xf32> to vector<16x288xf32>
    %105 = vector.broadcast %102 : vector<1x288xf32> to vector<16x288xf32>
    %106 = arith.mulf %104, %105 : vector<16x288xf32>
    %107 = arith.addf %100, %106 : vector<16x288xf32>
    %c0_56 = arith.constant 0 : index
    %c1_57 = arith.constant 1 : index
    %c36_58 = arith.constant 36 : index
    %108 = vector.load %arg3[%c0_56, %c1_57, %c36_58] : memref<1x4x384xf32, #tpu.memory_space<vmem>>, vector<1x1x288xf32>
    %109 = vector.shape_cast %108 : vector<1x1x288xf32> to vector<1x288xf32>
    %c0_59 = arith.constant 0 : index
    %c15 = arith.constant 15 : index
    %110 = vector.load %arg1[%c0_59, %c15] : memref<16x36xf32, #tpu.memory_space<vmem>>, vector<16x1xf32>
    %111 = vector.broadcast %110 : vector<16x1xf32> to vector<16x288xf32>
    %112 = vector.broadcast %109 : vector<1x288xf32> to vector<16x288xf32>
    %113 = arith.mulf %111, %112 : vector<16x288xf32>
    %114 = arith.addf %107, %113 : vector<16x288xf32>
    %c0_60 = arith.constant 0 : index
    %c1_61 = arith.constant 1 : index
    %c37_62 = arith.constant 37 : index
    %115 = vector.load %arg3[%c0_60, %c1_61, %c37_62] : memref<1x4x384xf32, #tpu.memory_space<vmem>>, vector<1x1x288xf32>
    %116 = vector.shape_cast %115 : vector<1x1x288xf32> to vector<1x288xf32>
    %c0_63 = arith.constant 0 : index
    %c16 = arith.constant 16 : index
    %117 = vector.load %arg1[%c0_63, %c16] : memref<16x36xf32, #tpu.memory_space<vmem>>, vector<16x1xf32>
    %118 = vector.broadcast %117 : vector<16x1xf32> to vector<16x288xf32>
    %119 = vector.broadcast %116 : vector<1x288xf32> to vector<16x288xf32>
    %120 = arith.mulf %118, %119 : vector<16x288xf32>
    %121 = arith.addf %114, %120 : vector<16x288xf32>
    %c0_64 = arith.constant 0 : index
    %c1_65 = arith.constant 1 : index
    %c38_66 = arith.constant 38 : index
    %122 = vector.load %arg3[%c0_64, %c1_65, %c38_66] : memref<1x4x384xf32, #tpu.memory_space<vmem>>, vector<1x1x288xf32>
    %123 = vector.shape_cast %122 : vector<1x1x288xf32> to vector<1x288xf32>
    %c0_67 = arith.constant 0 : index
    %c17 = arith.constant 17 : index
    %124 = vector.load %arg1[%c0_67, %c17] : memref<16x36xf32, #tpu.memory_space<vmem>>, vector<16x1xf32>
    %125 = vector.broadcast %124 : vector<16x1xf32> to vector<16x288xf32>
    %126 = vector.broadcast %123 : vector<1x288xf32> to vector<16x288xf32>
    %127 = arith.mulf %125, %126 : vector<16x288xf32>
    %128 = arith.addf %121, %127 : vector<16x288xf32>
    %c0_68 = arith.constant 0 : index
    %c2_69 = arith.constant 2 : index
    %c0_70 = arith.constant 0 : index
    %129 = vector.load %arg3[%c0_68, %c2_69, %c0_70] : memref<1x4x384xf32, #tpu.memory_space<vmem>>, vector<1x1x288xf32>
    %130 = vector.shape_cast %129 : vector<1x1x288xf32> to vector<1x288xf32>
    %c0_71 = arith.constant 0 : index
    %c18_72 = arith.constant 18 : index
    %131 = vector.load %arg1[%c0_71, %c18_72] : memref<16x36xf32, #tpu.memory_space<vmem>>, vector<16x1xf32>
    %132 = vector.broadcast %131 : vector<16x1xf32> to vector<16x288xf32>
    %133 = vector.broadcast %130 : vector<1x288xf32> to vector<16x288xf32>
    %134 = arith.mulf %132, %133 : vector<16x288xf32>
    %135 = arith.addf %128, %134 : vector<16x288xf32>
    %c0_73 = arith.constant 0 : index
    %c2_74 = arith.constant 2 : index
    %c1_75 = arith.constant 1 : index
    %136 = vector.load %arg3[%c0_73, %c2_74, %c1_75] : memref<1x4x384xf32, #tpu.memory_space<vmem>>, vector<1x1x288xf32>
    %137 = vector.shape_cast %136 : vector<1x1x288xf32> to vector<1x288xf32>
    %c0_76 = arith.constant 0 : index
    %c19_77 = arith.constant 19 : index
    %138 = vector.load %arg1[%c0_76, %c19_77] : memref<16x36xf32, #tpu.memory_space<vmem>>, vector<16x1xf32>
    %139 = vector.broadcast %138 : vector<16x1xf32> to vector<16x288xf32>
    %140 = vector.broadcast %137 : vector<1x288xf32> to vector<16x288xf32>
    %141 = arith.mulf %139, %140 : vector<16x288xf32>
    %142 = arith.addf %135, %141 : vector<16x288xf32>
    %c0_78 = arith.constant 0 : index
    %c2_79 = arith.constant 2 : index
    %c2_80 = arith.constant 2 : index
    %143 = vector.load %arg3[%c0_78, %c2_79, %c2_80] : memref<1x4x384xf32, #tpu.memory_space<vmem>>, vector<1x1x288xf32>
    %144 = vector.shape_cast %143 : vector<1x1x288xf32> to vector<1x288xf32>
    %c0_81 = arith.constant 0 : index
    %c20_82 = arith.constant 20 : index
    %145 = vector.load %arg1[%c0_81, %c20_82] : memref<16x36xf32, #tpu.memory_space<vmem>>, vector<16x1xf32>
    %146 = vector.broadcast %145 : vector<16x1xf32> to vector<16x288xf32>
    %147 = vector.broadcast %144 : vector<1x288xf32> to vector<16x288xf32>
    %148 = arith.mulf %146, %147 : vector<16x288xf32>
    %149 = arith.addf %142, %148 : vector<16x288xf32>
    %c0_83 = arith.constant 0 : index
    %c2_84 = arith.constant 2 : index
    %c18_85 = arith.constant 18 : index
    %150 = vector.load %arg3[%c0_83, %c2_84, %c18_85] : memref<1x4x384xf32, #tpu.memory_space<vmem>>, vector<1x1x288xf32>
    %151 = vector.shape_cast %150 : vector<1x1x288xf32> to vector<1x288xf32>
    %c0_86 = arith.constant 0 : index
    %c21 = arith.constant 21 : index
    %152 = vector.load %arg1[%c0_86, %c21] : memref<16x36xf32, #tpu.memory_space<vmem>>, vector<16x1xf32>
    %153 = vector.broadcast %152 : vector<16x1xf32> to vector<16x288xf32>
    %154 = vector.broadcast %151 : vector<1x288xf32> to vector<16x288xf32>
    %155 = arith.mulf %153, %154 : vector<16x288xf32>
    %156 = arith.addf %149, %155 : vector<16x288xf32>
    %c0_87 = arith.constant 0 : index
    %c2_88 = arith.constant 2 : index
    %c19_89 = arith.constant 19 : index
    %157 = vector.load %arg3[%c0_87, %c2_88, %c19_89] : memref<1x4x384xf32, #tpu.memory_space<vmem>>, vector<1x1x288xf32>
    %158 = vector.shape_cast %157 : vector<1x1x288xf32> to vector<1x288xf32>
    %c0_90 = arith.constant 0 : index
    %c22 = arith.constant 22 : index
    %159 = vector.load %arg1[%c0_90, %c22] : memref<16x36xf32, #tpu.memory_space<vmem>>, vector<16x1xf32>
    %160 = vector.broadcast %159 : vector<16x1xf32> to vector<16x288xf32>
    %161 = vector.broadcast %158 : vector<1x288xf32> to vector<16x288xf32>
    %162 = arith.mulf %160, %161 : vector<16x288xf32>
    %163 = arith.addf %156, %162 : vector<16x288xf32>
    %c0_91 = arith.constant 0 : index
    %c2_92 = arith.constant 2 : index
    %c20_93 = arith.constant 20 : index
    %164 = vector.load %arg3[%c0_91, %c2_92, %c20_93] : memref<1x4x384xf32, #tpu.memory_space<vmem>>, vector<1x1x288xf32>
    %165 = vector.shape_cast %164 : vector<1x1x288xf32> to vector<1x288xf32>
    %c0_94 = arith.constant 0 : index
    %c23 = arith.constant 23 : index
    %166 = vector.load %arg1[%c0_94, %c23] : memref<16x36xf32, #tpu.memory_space<vmem>>, vector<16x1xf32>
    %167 = vector.broadcast %166 : vector<16x1xf32> to vector<16x288xf32>
    %168 = vector.broadcast %165 : vector<1x288xf32> to vector<16x288xf32>
    %169 = arith.mulf %167, %168 : vector<16x288xf32>
    %170 = arith.addf %163, %169 : vector<16x288xf32>
    %c0_95 = arith.constant 0 : index
    %c2_96 = arith.constant 2 : index
    %c36_97 = arith.constant 36 : index
    %171 = vector.load %arg3[%c0_95, %c2_96, %c36_97] : memref<1x4x384xf32, #tpu.memory_space<vmem>>, vector<1x1x288xf32>
    %172 = vector.shape_cast %171 : vector<1x1x288xf32> to vector<1x288xf32>
    %c0_98 = arith.constant 0 : index
    %c24 = arith.constant 24 : index
    %173 = vector.load %arg1[%c0_98, %c24] : memref<16x36xf32, #tpu.memory_space<vmem>>, vector<16x1xf32>
    %174 = vector.broadcast %173 : vector<16x1xf32> to vector<16x288xf32>
    %175 = vector.broadcast %172 : vector<1x288xf32> to vector<16x288xf32>
    %176 = arith.mulf %174, %175 : vector<16x288xf32>
    %177 = arith.addf %170, %176 : vector<16x288xf32>
    %c0_99 = arith.constant 0 : index
    %c2_100 = arith.constant 2 : index
    %c37_101 = arith.constant 37 : index
    %178 = vector.load %arg3[%c0_99, %c2_100, %c37_101] : memref<1x4x384xf32, #tpu.memory_space<vmem>>, vector<1x1x288xf32>
    %179 = vector.shape_cast %178 : vector<1x1x288xf32> to vector<1x288xf32>
    %c0_102 = arith.constant 0 : index
    %c25 = arith.constant 25 : index
    %180 = vector.load %arg1[%c0_102, %c25] : memref<16x36xf32, #tpu.memory_space<vmem>>, vector<16x1xf32>
    %181 = vector.broadcast %180 : vector<16x1xf32> to vector<16x288xf32>
    %182 = vector.broadcast %179 : vector<1x288xf32> to vector<16x288xf32>
    %183 = arith.mulf %181, %182 : vector<16x288xf32>
    %184 = arith.addf %177, %183 : vector<16x288xf32>
    %c0_103 = arith.constant 0 : index
    %c2_104 = arith.constant 2 : index
    %c38_105 = arith.constant 38 : index
    %185 = vector.load %arg3[%c0_103, %c2_104, %c38_105] : memref<1x4x384xf32, #tpu.memory_space<vmem>>, vector<1x1x288xf32>
    %186 = vector.shape_cast %185 : vector<1x1x288xf32> to vector<1x288xf32>
    %c0_106 = arith.constant 0 : index
    %c26 = arith.constant 26 : index
    %187 = vector.load %arg1[%c0_106, %c26] : memref<16x36xf32, #tpu.memory_space<vmem>>, vector<16x1xf32>
    %188 = vector.broadcast %187 : vector<16x1xf32> to vector<16x288xf32>
    %189 = vector.broadcast %186 : vector<1x288xf32> to vector<16x288xf32>
    %190 = arith.mulf %188, %189 : vector<16x288xf32>
    %191 = arith.addf %184, %190 : vector<16x288xf32>
    %c0_107 = arith.constant 0 : index
    %c3_108 = arith.constant 3 : index
    %c0_109 = arith.constant 0 : index
    %192 = vector.load %arg3[%c0_107, %c3_108, %c0_109] : memref<1x4x384xf32, #tpu.memory_space<vmem>>, vector<1x1x288xf32>
    %193 = vector.shape_cast %192 : vector<1x1x288xf32> to vector<1x288xf32>
    %c0_110 = arith.constant 0 : index
    %c27 = arith.constant 27 : index
    %194 = vector.load %arg1[%c0_110, %c27] : memref<16x36xf32, #tpu.memory_space<vmem>>, vector<16x1xf32>
    %195 = vector.broadcast %194 : vector<16x1xf32> to vector<16x288xf32>
    %196 = vector.broadcast %193 : vector<1x288xf32> to vector<16x288xf32>
    %197 = arith.mulf %195, %196 : vector<16x288xf32>
    %198 = arith.addf %191, %197 : vector<16x288xf32>
    %c0_111 = arith.constant 0 : index
    %c3_112 = arith.constant 3 : index
    %c1_113 = arith.constant 1 : index
    %199 = vector.load %arg3[%c0_111, %c3_112, %c1_113] : memref<1x4x384xf32, #tpu.memory_space<vmem>>, vector<1x1x288xf32>
    %200 = vector.shape_cast %199 : vector<1x1x288xf32> to vector<1x288xf32>
    %c0_114 = arith.constant 0 : index
    %c28 = arith.constant 28 : index
    %201 = vector.load %arg1[%c0_114, %c28] : memref<16x36xf32, #tpu.memory_space<vmem>>, vector<16x1xf32>
    %202 = vector.broadcast %201 : vector<16x1xf32> to vector<16x288xf32>
    %203 = vector.broadcast %200 : vector<1x288xf32> to vector<16x288xf32>
    %204 = arith.mulf %202, %203 : vector<16x288xf32>
    %205 = arith.addf %198, %204 : vector<16x288xf32>
    %c0_115 = arith.constant 0 : index
    %c3_116 = arith.constant 3 : index
    %c2_117 = arith.constant 2 : index
    %206 = vector.load %arg3[%c0_115, %c3_116, %c2_117] : memref<1x4x384xf32, #tpu.memory_space<vmem>>, vector<1x1x288xf32>
    %207 = vector.shape_cast %206 : vector<1x1x288xf32> to vector<1x288xf32>
    %c0_118 = arith.constant 0 : index
    %c29 = arith.constant 29 : index
    %208 = vector.load %arg1[%c0_118, %c29] : memref<16x36xf32, #tpu.memory_space<vmem>>, vector<16x1xf32>
    %209 = vector.broadcast %208 : vector<16x1xf32> to vector<16x288xf32>
    %210 = vector.broadcast %207 : vector<1x288xf32> to vector<16x288xf32>
    %211 = arith.mulf %209, %210 : vector<16x288xf32>
    %212 = arith.addf %205, %211 : vector<16x288xf32>
    %c0_119 = arith.constant 0 : index
    %c3_120 = arith.constant 3 : index
    %c18_121 = arith.constant 18 : index
    %213 = vector.load %arg3[%c0_119, %c3_120, %c18_121] : memref<1x4x384xf32, #tpu.memory_space<vmem>>, vector<1x1x288xf32>
    %214 = vector.shape_cast %213 : vector<1x1x288xf32> to vector<1x288xf32>
    %c0_122 = arith.constant 0 : index
    %c30 = arith.constant 30 : index
    %215 = vector.load %arg1[%c0_122, %c30] : memref<16x36xf32, #tpu.memory_space<vmem>>, vector<16x1xf32>
    %216 = vector.broadcast %215 : vector<16x1xf32> to vector<16x288xf32>
    %217 = vector.broadcast %214 : vector<1x288xf32> to vector<16x288xf32>
    %218 = arith.mulf %216, %217 : vector<16x288xf32>
    %219 = arith.addf %212, %218 : vector<16x288xf32>
    %c0_123 = arith.constant 0 : index
    %c3_124 = arith.constant 3 : index
    %c19_125 = arith.constant 19 : index
    %220 = vector.load %arg3[%c0_123, %c3_124, %c19_125] : memref<1x4x384xf32, #tpu.memory_space<vmem>>, vector<1x1x288xf32>
    %221 = vector.shape_cast %220 : vector<1x1x288xf32> to vector<1x288xf32>
    %c0_126 = arith.constant 0 : index
    %c31 = arith.constant 31 : index
    %222 = vector.load %arg1[%c0_126, %c31] : memref<16x36xf32, #tpu.memory_space<vmem>>, vector<16x1xf32>
    %223 = vector.broadcast %222 : vector<16x1xf32> to vector<16x288xf32>
    %224 = vector.broadcast %221 : vector<1x288xf32> to vector<16x288xf32>
    %225 = arith.mulf %223, %224 : vector<16x288xf32>
    %226 = arith.addf %219, %225 : vector<16x288xf32>
    %c0_127 = arith.constant 0 : index
    %c3_128 = arith.constant 3 : index
    %c20_129 = arith.constant 20 : index
    %227 = vector.load %arg3[%c0_127, %c3_128, %c20_129] : memref<1x4x384xf32, #tpu.memory_space<vmem>>, vector<1x1x288xf32>
    %228 = vector.shape_cast %227 : vector<1x1x288xf32> to vector<1x288xf32>
    %c0_130 = arith.constant 0 : index
    %c32 = arith.constant 32 : index
    %229 = vector.load %arg1[%c0_130, %c32] : memref<16x36xf32, #tpu.memory_space<vmem>>, vector<16x1xf32>
    %230 = vector.broadcast %229 : vector<16x1xf32> to vector<16x288xf32>
    %231 = vector.broadcast %228 : vector<1x288xf32> to vector<16x288xf32>
    %232 = arith.mulf %230, %231 : vector<16x288xf32>
    %233 = arith.addf %226, %232 : vector<16x288xf32>
    %c0_131 = arith.constant 0 : index
    %c3_132 = arith.constant 3 : index
    %c36_133 = arith.constant 36 : index
    %234 = vector.load %arg3[%c0_131, %c3_132, %c36_133] : memref<1x4x384xf32, #tpu.memory_space<vmem>>, vector<1x1x288xf32>
    %235 = vector.shape_cast %234 : vector<1x1x288xf32> to vector<1x288xf32>
    %c0_134 = arith.constant 0 : index
    %c33 = arith.constant 33 : index
    %236 = vector.load %arg1[%c0_134, %c33] : memref<16x36xf32, #tpu.memory_space<vmem>>, vector<16x1xf32>
    %237 = vector.broadcast %236 : vector<16x1xf32> to vector<16x288xf32>
    %238 = vector.broadcast %235 : vector<1x288xf32> to vector<16x288xf32>
    %239 = arith.mulf %237, %238 : vector<16x288xf32>
    %240 = arith.addf %233, %239 : vector<16x288xf32>
    %c0_135 = arith.constant 0 : index
    %c3_136 = arith.constant 3 : index
    %c37_137 = arith.constant 37 : index
    %241 = vector.load %arg3[%c0_135, %c3_136, %c37_137] : memref<1x4x384xf32, #tpu.memory_space<vmem>>, vector<1x1x288xf32>
    %242 = vector.shape_cast %241 : vector<1x1x288xf32> to vector<1x288xf32>
    %c0_138 = arith.constant 0 : index
    %c34 = arith.constant 34 : index
    %243 = vector.load %arg1[%c0_138, %c34] : memref<16x36xf32, #tpu.memory_space<vmem>>, vector<16x1xf32>
    %244 = vector.broadcast %243 : vector<16x1xf32> to vector<16x288xf32>
    %245 = vector.broadcast %242 : vector<1x288xf32> to vector<16x288xf32>
    %246 = arith.mulf %244, %245 : vector<16x288xf32>
    %247 = arith.addf %240, %246 : vector<16x288xf32>
    %c0_139 = arith.constant 0 : index
    %c3_140 = arith.constant 3 : index
    %c38_141 = arith.constant 38 : index
    %248 = vector.load %arg3[%c0_139, %c3_140, %c38_141] : memref<1x4x384xf32, #tpu.memory_space<vmem>>, vector<1x1x288xf32>
    %249 = vector.shape_cast %248 : vector<1x1x288xf32> to vector<1x288xf32>
    %c0_142 = arith.constant 0 : index
    %c35 = arith.constant 35 : index
    %250 = vector.load %arg1[%c0_142, %c35] : memref<16x36xf32, #tpu.memory_space<vmem>>, vector<16x1xf32>
    %251 = vector.broadcast %250 : vector<16x1xf32> to vector<16x288xf32>
    %252 = vector.broadcast %249 : vector<1x288xf32> to vector<16x288xf32>
    %253 = arith.mulf %251, %252 : vector<16x288xf32>
    %254 = arith.addf %247, %253 : vector<16x288xf32>
    %c0_143 = arith.constant 0 : index
    %c0_144 = arith.constant 0 : index
    %c0_145 = arith.constant 0 : index
    %255 = vector.load %arg4[%c0_143, %c0_144, %c0_145] : memref<1x16x288xf32, #tpu.memory_space<vmem>>, vector<1x16x288xf32>
    %256 = vector.shape_cast %255 : vector<1x16x288xf32> to vector<16x288xf32>
    %257 = vector.shape_cast %254 : vector<16x288xf32> to vector<1x16x288xf32>
    tpu.vector_store %arg4[%c0_143, %c0_144, %c0_145], %257 {strides = array<i32>} : memref<1x16x288xf32, #tpu.memory_space<vmem>>, vector<1x16x288xf32>,
    return
  }
  func.func @transform_0(%arg0: i32) -> (i32, i32) {
    %c0_i32 = arith.constant 0 : i32
    %c0_i32_0 = arith.constant 0 : i32
    %c0_i32_1 = arith.constant 0 : i32
    return %c0_i32, %c0_i32_0 : i32, i32
  }
  func.func @transform_1(%arg0: i32) -> (i32, i32) {
    %c0_i32 = arith.constant 0 : i32
    %c0_i32_0 = arith.constant 0 : i32
    %c0_i32_1 = arith.constant 0 : i32
    return %c0_i32, %c0_i32_0 : i32, i32
  }
  func.func @transform_2(%arg0: i32) -> (i32, i32, i32) {
    %c0_i32 = arith.constant 0 : i32
    %c0_i32_0 = arith.constant 0 : i32
    %c0_i32_1 = arith.constant 0 : i32
    return %arg0, %c0_i32, %c0_i32_0 : i32, i32, i32
  }
  func.func @transform_3(%arg0: i32) -> (i32, i32, i32) {
    %c0_i32 = arith.constant 0 : i32
    %c0_i32_0 = arith.constant 0 : i32
    %c0_i32_1 = arith.constant 0 : i32
    return %arg0, %c0_i32, %c0_i32_0 : i32, i32, i32
  }
}

</mosaic_0001>

<bundles_post_ra>
// kernel: tile.0
= control target key start
LH: loop header
LB: loop body
LE: loop exit
PB: predicated region body
PF: predicated region fallthrough
CT: control target
= control target key end

     0   :  { %s34_s8 = smov 125   ;;  %s35_s9 = smov 126   ;;  %vm7_vm0 = vcmask 7168   ;;  %s61_s0 = inlined_call_operand.vmem [shape: f32[4,4], index: 0, kind: input, shape index: {}]   ;;  %s62_s1 = inlined_call_operand.vmem [shape: f32[16,1], index: 1, kind: output, shape index: {}]  }
   0x1   :  { %v4_v0 = vld [vmem:[%s61_s0] sm:$0xf]  ;;  %s33_s0 = smov 127  }
   0x2   :  { %5 = vst [vmem:[#allocation0] sm:$0xf] %v4_v0 }
   0x9   :  { %v9_v1 = vld [vmem:[#allocation0] sm:$0xf]  }
   0xa   :  { %v21_v2 = vld [vmem:[#allocation0] sm:$0xf]   ;;  %10 = vrot.lane.b32.xlu0 %v9_v1, %s33_s0 }
   0xb   :  { %22 = vrot.lane.b32.xlu1 %v21_v2, %s34_s8  ;;  %v15_v3 = vld [vmem:[#allocation0] sm:$0xf]  }
   0xc   :  { %v6_v4 = vld [vmem:[#allocation0] sm:$0xf]  }
   0xd   :  { %8 = vst.msk [vmem:[%s62_s1] ss:$4 sm:$0xf] %vm7_vm0, %v6_v4  }
  0x12   :  { %16 = vrot.lane.b32.xlu0 %v15_v3, %s35_s9 }
  0x7c   :  { %v11_v5 = vpop.permute.xlu0 %10  }
  0x7d   :  { %v23_v6 = vpop.permute.xlu1 %22   ;;  %27 = vst.msk [vmem:[%s62_s1 + $0x1] ss:$4 sm:$0xf] %vm7_vm0, %v11_v5  }
  0x7e   :  { %29 = vst.msk [vmem:[%s62_s1 + $0x3] ss:$4 sm:$0xf] %vm7_vm0, %v23_v6  }
  0x84   :  { %v17_v7 = vpop.permute.xlu0 %16  }
  0x85   :  { %28 = vst.msk [vmem:[%s62_s1 + $0x2] ss:$4 sm:$0xf] %vm7_vm0, %v17_v7  }

// kernel: tile.8
= control target key start
LH: loop header
LB: loop body
LE: loop exit
PB: predicated region body
PF: predicated region fallthrough
CT: control target
= control target key end

     0   :  { %s22_s0 = inlined_call_operand.vmem [shape: f32[4], index: 0, kind: input, shape index: {}]   ;;  %s23_s1 = inlined_call_operand.vmem [shape: f32[4,4], index: 1, kind: output, shape index: {}]  }
   0x1   :  { %v4_v0 = vld [vmem:[%s22_s0] ss:$0 sm:$0xff] }
   0x2   :  { %5 = vst [vmem:[%s23_s1] sm:$0xf] %v4_v0 }

// kernel: upsample_forward.1
= control target key start
LH: loop header
LB: loop body
LE: loop exit
PB: predicated region body
PF: predicated region fallthrough
CT: control target
= control target key end

     0   :  { %s2122_s12 = smov 0   ;;  %s3248_s0 = inlined_call_operand.vmem [shape: f32[16,36], index: 0, kind: input, shape index: {}]   ;;  %s3249_s1 = inlined_call_operand.vmem [shape: f32[16,1], index: 1, kind: input, shape index: {}]   ;;  %s3250_s2 = inlined_call_operand.vmem [shape: f32[2,4,384], index: 2, kind: input, shape index: {}]   ;;  %s3251_s3 = inlined_call_operand.vmem [shape: f32[2,16,288], index: 3, kind: output, shape index: {}]  }
   0x1 LB: > { %s1908_s13 = sadd.s32 4294967295, %s2056_s12   ;;  %p1912_p0 = scmp.ge.s32.totalorder %s2056_s12, 1  ;;  %s2056_s12 = sphi %s2122_s12, %s13_s12  }
   0x2   : > { %p137_p1 = scmp.lt.s32.totalorder %s2056_s12, 3 }
   0x4   : > { %p138_p2 = pnand %p1912_p0, %p137_p1 }
   0x6   : > { %141 = sbr.rel (%p138_p2) target bundleno = 3553 (0xde1), region = 32 }
   0xb   : > { %v2133_v0 = vld [vmem:[%s3248_s0] sm:$0xff]  ;;  %v2058_v2 = vmov 1   ;;  %v2059_v3 = vmov 0   ;;  %v2143_v4 = vld [vmem:[%s3248_s0 + $0x8] sm:$0xff]  ;;  %v2060_v6 = vmov 2   ;;  %v2061_v7 = vmov 3  }
   0xc   : > { %v171_v1 = vld [vmem:[%s3249_s1] sm:$0xff]  ;;  %1976 = vset.pattern.permute.xlu2 %v2058_v2  ;;  %1975 = vset.pattern.permute.xlu1 %v2059_v3  ;;  %v172_v5 = vld [vmem:[%s3249_s1 + $0x8] sm:$0xff]  ;;  %v2062_v8 = vmov 4   ;;  %v2063_v9 = vmov 5   ;;  %p161_p3 = scmp.lt.s32.totalorder %s1908_s13, 1  ;;  %s2064_s26 = smov 127  }
   0xd   : > { %1974 = vset.pattern.permute.xlu0 %v2059_v3  ;;  %216 = vperm.xlu2 %1976, %v2133_v0   ;;  %s2065_s27 = smov 126   ;;  %v2066_v31 = vmov 6   ;;  %s2067_s28 = smov 110   ;;  %vm247_vm0 = vcmask 1039360   ;;  %vm296_vm1 = vcmask 1031168   ;;  %vm345_vm2 = vcmask 900096  }
   0xe   : > { %188 = vperm.xlu1 %1975, %v2133_v0   ;;  %175 = vperm.xlu0 %1974, %v171_v1   ;;  %s3333_s13 = smov (!%p161_p3, %s1908_s13), 1  ;;  %s2068_s29 = smov 109   ;;  %vm394_vm3 = vcmask 891904   ;;  %vm443_vm4 = vcmask 883712   ;;  %vm492_vm5 = vcmask 752640   ;;  %vm541_vm6 = vcmask 744448  }
   0xf   : > { %s1920_s22 = smul.u32 12, %s3333_s13  ;;  %s2069_s30 = smov 108   ;;  %vm590_vm7 = vcmask 736256   ;;  %vm1848_vm8 = vcmask 261120  }
  0x10   : > { %s2071_s4 = smov 92   ;;  %s2073_s5 = smov 91  }
  0x11   : > { %s2168_s25 = scalar_lea.vmem %s3250_s2, %s1920_s22  ;;  %s2076_s6 = smov 90  }
  0x12   : > { %v183_v10 = vld [vmem:[%s2168_s25] ss:$4 sm:$0x7]  ;;  %s1921_s17 = smul.u32 48, %s3333_s13 }
  0x13   : > { %v2171_v11 = vperm.slane %v183_v10, 2  ;;  %v2173_v12 = vperm.slane %v183_v10, 1  ;;  %v2175_v13 = vperm.slane %v183_v10, 0 }
  0x14   : > { %s3221_s20 = scalar_lea.vmem %s3251_s3, %s1921_s17 }
  0x15   : > { %220 = vperm.xlu2 %1976, %v2143_v4  }
  0x16   : > { %193 = vperm.xlu1 %1975, %v2143_v4   ;;  %180 = vperm.xlu0 %1974, %v172_v5  }
  0x1e   : > { %1978 = vset.pattern.permute.xlu1 %v2060_v6  ;;  %1977 = vset.pattern.permute.xlu0 %v2060_v6 }
  0x1f   : > { %269 = vperm.xlu1 %1978, %v2143_v4   ;;  %265 = vperm.xlu0 %1977, %v2133_v0  }
  0x27   : > { %1980 = vset.pattern.permute.xlu1 %v2061_v7  ;;  %1979 = vset.pattern.permute.xlu0 %v2061_v7 }
  0x28   : > { %318 = vperm.xlu1 %1980, %v2143_v4   ;;  %314 = vperm.xlu0 %1979, %v2133_v0  }
  0x30   : > { %1982 = vset.pattern.permute.xlu1 %v2062_v8  ;;  %1981 = vset.pattern.permute.xlu0 %v2062_v8 }
  0x31   : > { %367 = vperm.xlu1 %1982, %v2143_v4   ;;  %363 = vperm.xlu0 %1981, %v2133_v0  }
  0x39   : > { %1984 = vset.pattern.permute.xlu1 %v2063_v9  ;;  %1983 = vset.pattern.permute.xlu0 %v2063_v9 }
  0x3a   : > { %416 = vperm.xlu1 %1984, %v2143_v4   ;;  %412 = vperm.xlu0 %1983, %v2133_v0  }
  0x42   : > { %1986 = vset.pattern.permute.xlu1 %v2066_v31  ;;  %1985 = vset.pattern.permute.xlu0 %v2066_v31 }
  0x67   : > { %v217_v14 = vpop.permute.xlu2 %216 }
  0x68   : > { %v225_v15 = vmul.f32 %v217_v14, %v2171_v11  ;;  %v224_v16 = vmul.f32 %v217_v14, %v2173_v12  ;;  %v223_v17 = vmul.f32 %v217_v14, %v2175_v13 }
  0x6a   : > { %239 = vrot.lane.b32.xlu2 %v225_v15, %s2064_s26  ;;  %237 = vrot.lane.b32.xlu1 %v224_v16, %s2064_s26  ;;  %v2070_v16 = vmov 7  }
  0x6b   : > { %235 = vrot.lane.b32.xlu0 %v223_v17, %s2064_s26 }
  0x6f   : > { %v221_v18 = vpop.permute.xlu2 %220 }
  0x70   : > { %v228_v19 = vmul.f32 %v221_v18, %v2171_v11  ;;  %v227_v20 = vmul.f32 %v221_v18, %v2173_v12  ;;  %v226_v21 = vmul.f32 %v221_v18, %v2175_v13 }
  0x72   : > { %245 = vrot.lane.b32.xlu2 %v228_v19, %s2064_s26  ;;  %243 = vrot.lane.b32.xlu1 %v227_v20, %s2064_s26 }
  0x73   : > { %241 = vrot.lane.b32.xlu0 %v226_v21, %s2064_s26 }
  0x80   : > { %v2189_v22 = vpop.permute.xlu1 %188  ;;  %v2191_v23 = vpop.permute.xlu0 %175 }
  0x88   : > { %v2193_v24 = vpop.permute.xlu0 %180  ;;  %v2195_v25 = vpop.permute.xlu1 %193 }
  0x89   : > { %3274 = vst [vmem:[#allocation2_spill] sm:$0xff] %v2195_v25 }
  0x91   : > { %v266_v26 = vpop.permute.xlu0 %265  ;;  %v270_v27 = vpop.permute.xlu1 %269 }
  0x92   : > { %v273_v28 = vmul.f32 %v266_v26, %v2173_v12  ;;  %v272_v29 = vmul.f32 %v266_v26, %v2175_v13  ;;  %v275_v30 = vmul.f32 %v270_v27, %v2175_v13  ;;  %v276_v32 = vmul.f32 %v270_v27, %v2173_v12 }
  0x93   : > { %v274_v34 = vmul.f32 %v266_v26, %v2171_v11  ;;  %v277_v38 = vmul.f32 %v270_v27, %v2171_v11 }
  0x94   : > { %286 = vrot.lane.b32.xlu1 %v273_v28, %s2065_s27  ;;  %284 = vrot.lane.b32.xlu2 %v272_v29, %s2065_s27  ;;  %v2072_v29 = vmov 8  }
  0x95   : > { %290 = vrot.lane.b32.xlu0 %v275_v30, %s2065_s27 }
  0x9a   : > { %v319_v33 = vpop.permute.xlu1 %318  ;;  %v315_v36 = vpop.permute.xlu0 %314 }
  0x9b   : > { %v324_v35 = vmul.f32 %v319_v33, %v2175_v13  ;;  %v322_v37 = vmul.f32 %v315_v36, %v2173_v12  ;;  %v325_v41 = vmul.f32 %v319_v33, %v2173_v12  ;;  %v321_v42 = vmul.f32 %v315_v36, %v2175_v13 }
  0x9c   : > { %292 = vrot.lane.b32.xlu1 %v276_v32, %s2065_s27  ;;  %288 = vrot.lane.b32.xlu2 %v274_v34, %s2065_s27  ;;  %v323_v47 = vmul.f32 %v315_v36, %v2171_v11  ;;  %v326_v49 = vmul.f32 %v319_v33, %v2171_v11 }
  0x9d   : > { %339 = vrot.lane.b32.xlu0 %v324_v35, %s2067_s28 }
  0xa3   : > { %v368_v39 = vpop.permute.xlu1 %367  ;;  %v364_v45 = vpop.permute.xlu0 %363 }
  0xa4   : > { %335 = vrot.lane.b32.xlu1 %v322_v37, %s2067_s28  ;;  %294 = vrot.lane.b32.xlu2 %v277_v38, %s2065_s27  ;;  %v373_v40 = vmul.f32 %v368_v39, %v2175_v13  ;;  %v371_v46 = vmul.f32 %v364_v45, %v2173_v12  ;;  %v374_v48 = vmul.f32 %v368_v39, %v2173_v12 }
  0xa5   : > { %v370_v52 = vmul.f32 %v364_v45, %v2175_v13  ;;  %v372_v54 = vmul.f32 %v364_v45, %v2171_v11  ;;  %v375_v55 = vmul.f32 %v368_v39, %v2171_v11 }
  0xa6   : > { %388 = vrot.lane.b32.xlu0 %v373_v40, %s2068_s29 }
  0xac   : > { %v417_v43 = vpop.permute.xlu1 %416  ;;  %341 = vrot.lane.b32.xlu1 %v325_v41, %s2067_s28  ;;  %333 = vrot.lane.b32.xlu2 %v321_v42, %s2067_s28  ;;  %v413_v50 = vpop.permute.xlu0 %412 }
  0xad   : > { %v422_v44 = vmul.f32 %v417_v43, %v2175_v13  ;;  %v420_v51 = vmul.f32 %v413_v50, %v2173_v12  ;;  %v423_v53 = vmul.f32 %v417_v43, %v2173_v12  ;;  %v419_v56 = vmul.f32 %v413_v50, %v2175_v13 }
  0xae   : > { %v421_v57 = vmul.f32 %v413_v50, %v2171_v11  ;;  %v424_v58 = vmul.f32 %v417_v43, %v2171_v11  ;;  %v2074_v50 = vmov 9  }
  0xaf   : > { %437 = vrot.lane.b32.xlu0 %v422_v44, %s2069_s30 }
  0xb4   : > { %384 = vrot.lane.b32.xlu1 %v371_v46, %s2068_s29  ;;  %337 = vrot.lane.b32.xlu2 %v323_v47, %s2067_s28 }
  0xb7   : > { %461 = vperm.xlu0 %1985, %v2133_v0  }
  0xbc   : > { %390 = vrot.lane.b32.xlu1 %v374_v48, %s2068_s29  ;;  %343 = vrot.lane.b32.xlu2 %v326_v49, %s2067_s28 }
  0xbf   : > { %1987 = vset.pattern.permute.xlu0 %v2070_v16 }
  0xc4   : > { %433 = vrot.lane.b32.xlu1 %v420_v51, %s2069_s30  ;;  %382 = vrot.lane.b32.xlu2 %v370_v52, %s2068_s29  ;;  %v2313_v41 = vpop.permute.xlu2 %239  ;;  %v2075_v51 = vmov 10  }
  0xc5   : > { %1993 = vset.pattern.permute.xlu2 %v2075_v51 }
  0xcc   : > { %439 = vrot.lane.b32.xlu1 %v423_v53, %s2069_s30  ;;  %386 = vrot.lane.b32.xlu2 %v372_v54, %s2068_s29  ;;  %v2315_v42 = vpop.permute.xlu2 %245 }
  0xcd   : > { %3277 = vst [vmem:[#allocation5_spill] sm:$0xff] %v2315_v42 }
  0xd4   : > { %465 = vperm.xlu1 %1986, %v2143_v4   ;;  %392 = vrot.lane.b32.xlu2 %v375_v55, %s2068_s29 }
  0xdc   : > { %431 = vrot.lane.b32.xlu2 %v419_v56, %s2069_s30  ;;  %v2247_v59 = vpop.permute.xlu1 %237  ;;  %1988 = vset.pattern.permute.xlu1 %v2070_v16 }
  0xdd   : > { %v2249_v60 = vpop.permute.xlu0 %235 }
  0xe4   : > { %435 = vrot.lane.b32.xlu2 %v421_v57, %s2069_s30  ;;  %v2251_v61 = vpop.permute.xlu1 %243 }
  0xe5   : > { %v2253_v62 = vpop.permute.xlu0 %241 }
  0xec   : > { %441 = vrot.lane.b32.xlu2 %v424_v58, %s2069_s30 }
  0xee   : > { %v2317_v43 = vpop.permute.xlu2 %284 }
  0xf6   : > { %v2319_v44 = vpop.permute.xlu2 %288 }
  0xfe   : > { %v2321_v45 = vpop.permute.xlu2 %294 }
 0x106   : > { %v2255_v63 = vpop.permute.xlu1 %286  ;;  %v2323_v46 = vpop.permute.xlu2 %333 }
 0x107   : > { %v2257_v1 = vpop.permute.xlu0 %290 }
 0x10e   : > { %v2259_v2 = vpop.permute.xlu1 %292  ;;  %v2325_v47 = vpop.permute.xlu2 %337 }
 0x10f   : > { %v2261_v3 = vpop.permute.xlu0 %339 }
 0x116   : > { %v2263_v5 = vpop.permute.xlu1 %335  ;;  %v2327_v48 = vpop.permute.xlu2 %343 }
 0x118   : > { %v2265_v6 = vpop.permute.xlu0 %388 }
 0x11e   : > { %v2267_v7 = vpop.permute.xlu1 %341  ;;  %v2329_v49 = vpop.permute.xlu2 %382 }
 0x11f   : > { %3278 = vst [vmem:[#allocation6_spill] sm:$0xff] %v2329_v49 }
 0x121   : > { %v2269_v8 = vpop.permute.xlu0 %437 }
 0x126   : > { %v2271_v9 = vpop.permute.xlu1 %384  ;;  %v2331_v52 = vpop.permute.xlu2 %386 }
 0x129   : > { %v462_v10 = vpop.permute.xlu0 %461 }
 0x12a   : > { %v469_v14 = vmul.f32 %v462_v10, %v2173_v12  ;;  %v468_v15 = vmul.f32 %v462_v10, %v2175_v13  ;;  %v470_v18 = vmul.f32 %v462_v10, %v2171_v11 }
 0x12c   : > { %482 = vrot.lane.b32.xlu1 %v469_v14, %s2071_s4  ;;  %480 = vrot.lane.b32.xlu2 %v468_v15, %s2071_s4 }
 0x12e   : > { %v2277_v17 = vpop.permute.xlu1 %390  ;;  %v2339_v57 = vpop.permute.xlu2 %392 }
 0x134   : > { %484 = vrot.lane.b32.xlu2 %v470_v18, %s2071_s4 }
 0x136   : > { %v2281_v19 = vpop.permute.xlu1 %433 }
 0x137   : > { %3275 = vst [vmem:[#allocation3_spill] sm:$0xff] %v2281_v19  ;;  %v300_v19 = vsel %vm296_vm1, %v2259_v2, %v2321_v45 }
 0x13e   : > { %v2283_v20 = vpop.permute.xlu1 %439 }
 0x146   : > { %v466_v21 = vpop.permute.xlu1 %465 }
 0x147   : > { %v471_v26 = vmul.f32 %v466_v21, %v2175_v13  ;;  %v472_v27 = vmul.f32 %v466_v21, %v2173_v12  ;;  %v473_v28 = vmul.f32 %v466_v21, %v2171_v11  ;;  %v2348_v21 = vpop.permute.xlu2 %431 }
 0x148   : > { %3280 = vst [vmem:[#allocation8_spill] sm:$0xff] %v2348_v21 }
 0x149   : > { %486 = vrot.lane.b32.xlu0 %v471_v26, %s2071_s4  ;;  %488 = vrot.lane.b32.xlu1 %v472_v27, %s2071_s4 }
 0x14a   : > { %490 = vrot.lane.b32.xlu2 %v473_v28, %s2071_s4 }
 0x14f   : > { %v2357_v27 = vpop.permute.xlu2 %435 }
 0x151   : > { %510 = vperm.xlu0 %1987, %v2133_v0   ;;  %514 = vperm.xlu1 %1988, %v2143_v4  }
 0x157   : > { %v2361_v28 = vpop.permute.xlu2 %441 }
 0x159   : > { %1989 = vset.pattern.permute.xlu0 %v2072_v29  ;;  %1990 = vset.pattern.permute.xlu1 %v2072_v29 }
 0x186   : > { %v2363_v29 = vpop.permute.xlu2 %480 }
 0x187   : > { %3281 = vst [vmem:[#allocation9_spill] sm:$0xff] %v2363_v29 }
 0x19e   : > { %v2293_v30 = vpop.permute.xlu1 %482 }
 0x19f   : > { %3276 = vst [vmem:[#allocation4_spill] sm:$0xff] %v2293_v30 }
 0x1bb   : > { %v2295_v31 = vpop.permute.xlu1 %488  ;;  %v2297_v32 = vpop.permute.xlu0 %486 }
 0x1c3   : > { %v515_v33 = vpop.permute.xlu1 %514  ;;  %v511_v34 = vpop.permute.xlu0 %510 }
 0x1c4   : > { %v520_v35 = vmul.f32 %v515_v33, %v2175_v13  ;;  %v518_v36 = vmul.f32 %v511_v34, %v2173_v12  ;;  %v517_v37 = vmul.f32 %v511_v34, %v2175_v13  ;;  %v521_v38 = vmul.f32 %v515_v33, %v2173_v12 }
 0x1c5   : > { %v519_v39 = vmul.f32 %v511_v34, %v2171_v11  ;;  %v522_v40 = vmul.f32 %v515_v33, %v2171_v11  ;;  %v2365_v33 = vpop.permute.xlu2 %484 }
 0x1c6   : > { %535 = vrot.lane.b32.xlu0 %v520_v35, %s2073_s5  ;;  %531 = vrot.lane.b32.xlu1 %v518_v36, %s2073_s5  ;;  %3282 = vst [vmem:[#allocation10_spill] sm:$0xff] %v2365_v33 }
 0x1c7   : > { %529 = vrot.lane.b32.xlu2 %v517_v37, %s2073_s5 }
 0x1cd   : > { %v2367_v34 = vpop.permute.xlu2 %490 }
 0x1ce   : > { %559 = vperm.xlu0 %1989, %v2133_v0   ;;  %537 = vrot.lane.b32.xlu1 %v521_v38, %s2073_s5 }
 0x1cf   : > { %533 = vrot.lane.b32.xlu2 %v519_v39, %s2073_s5 }
 0x1d6   : > { %563 = vperm.xlu1 %1990, %v2143_v4   ;;  %1991 = vset.pattern.permute.xlu0 %v2074_v50 }
 0x1d7   : > { %539 = vrot.lane.b32.xlu2 %v522_v40, %s2073_s5 }
 0x1de   : > { %1992 = vset.pattern.permute.xlu1 %v2074_v50  ;;  %v1915_v50 = vld [vmem:[%s2168_s25 + $0x1] ss:$4 sm:$0x7] }
 0x221   : > { %v2369_v35 = vpop.permute.xlu2 %529 }
 0x222   : > { %3283 = vst [vmem:[#allocation11_spill] sm:$0xff] %v2369_v35 }
 0x229   : > { %v2371_v36 = vpop.permute.xlu2 %533 }
 0x22a   : > { %3284 = vst [vmem:[#allocation12_spill] sm:$0xff] %v2371_v36 }
 0x231   : > { %v2373_v37 = vpop.permute.xlu2 %539 }
 0x238   : > { %v2333_v53 = vpop.permute.xlu1 %531  ;;  %v2335_v54 = vpop.permute.xlu0 %535 }
 0x239   : > { %3279 = vst [vmem:[#allocation7_spill] sm:$0xff] %v2333_v53 }
 0x240   : > { %v2337_v55 = vpop.permute.xlu1 %537  ;;  %v560_v56 = vpop.permute.xlu0 %559 }
 0x241   : > { %v567_v58 = vmul.f32 %v560_v56, %v2173_v12  ;;  %v566_v10 = vmul.f32 %v560_v56, %v2175_v13  ;;  %v568_v18 = vmul.f32 %v560_v56, %v2171_v11  ;;  %v2384_v56 = vperm.slane %v1915_v50, 1 }
 0x243   : > { %580 = vrot.lane.b32.xlu1 %v567_v58, %s2076_s6  ;;  %578 = vrot.lane.b32.xlu2 %v566_v10, %s2076_s6  ;;  %v2077_v58 = vmov 11   ;;  %v2386_v10 = vperm.slane %v1915_v50, 0 }
 0x248   : > { %v564_v14 = vpop.permute.xlu1 %563 }
 0x249   : > { %v569_v15 = vmul.f32 %v564_v14, %v2175_v13  ;;  %v570_v16 = vmul.f32 %v564_v14, %v2173_v12  ;;  %v571_v26 = vmul.f32 %v564_v14, %v2171_v11 }
 0x24b   : > { %584 = vrot.lane.b32.xlu0 %v569_v15, %s2076_s6  ;;  %586 = vrot.lane.b32.xlu1 %v570_v16, %s2076_s6 }
 0x24c   : > { %582 = vrot.lane.b32.xlu2 %v568_v18, %s2076_s6 }
 0x253   : > { %610 = vperm.xlu0 %1991, %v2133_v0   ;;  %614 = vperm.xlu1 %1992, %v2143_v4  }
 0x254   : > { %588 = vrot.lane.b32.xlu2 %v571_v26, %s2076_s6 }
 0x25b   : > { %1994 = vset.pattern.permute.xlu1 %v2075_v51  ;;  %v2382_v51 = vperm.slane %v1915_v50, 2  ;;  %1996 = vset.pattern.permute.xlu0 %v2077_v58 }
 0x25c   : > { %637 = vperm.xlu2 %1993, %v2133_v0   ;;  %641 = vperm.xlu1 %1994, %v2143_v4  }
 0x264   : > { %1995 = vset.pattern.permute.xlu2 %v2077_v58 }
 0x29d   : > { %v2375_v38 = vpop.permute.xlu2 %578 }
 0x29e   : > { %3285 = vst [vmem:[#allocation13_spill] sm:$0xff] %v2375_v38 }
 0x2a6   : > { %v2377_v39 = vpop.permute.xlu2 %582 }
 0x2a7   : > { %3286 = vst [vmem:[#allocation14_spill] sm:$0xff] %v2377_v39 }
 0x2ae   : > { %v2379_v40 = vpop.permute.xlu2 %588 }
 0x2b5   : > { %v2388_v14 = vpop.permute.xlu1 %580 }
 0x2b6   : > { %3287 = vst [vmem:[#allocation15_spill] sm:$0xff] %v2388_v14  ;;  %v638_v15 = vpop.permute.xlu2 %637 }
 0x2b7   : > { %v646_v16 = vmul.f32 %v638_v15, %v2382_v51  ;;  %v645_v18 = vmul.f32 %v638_v15, %v2384_v56  ;;  %v644_v26 = vmul.f32 %v638_v15, %v2386_v10 }
 0x2b9   : > { %660 = vrot.lane.b32.xlu1 %v646_v16, %s2064_s26  ;;  %658 = vrot.lane.b32.xlu0 %v645_v18, %s2064_s26 }
 0x2ba   : > { %656 = vrot.lane.b32.xlu2 %v644_v26, %s2064_s26  ;;  %v2078_v26 = vmov 12  }
 0x2bd   : > { %v2396_v38 = vpop.permute.xlu1 %586  ;;  %v2410_v16 = vpop.permute.xlu0 %584 }
 0x2c5   : > { %v2398_v58 = vpop.permute.xlu1 %614 }
 0x2ce   : > { %v642_v50 = vpop.permute.xlu1 %641 }
 0x2cf   : > { %v649_v35 = vmul.f32 %v642_v50, %v2382_v51  ;;  %v648_v14 = vmul.f32 %v642_v50, %v2384_v56  ;;  %v647_v39 = vmul.f32 %v642_v50, %v2386_v10  ;;  %v2414_v50 = vpop.permute.xlu0 %610 }
 0x2d0   : > { %3289 = vst [vmem:[#allocation17_spill] sm:$0xff] %v2414_v50 }
 0x2d1   : > { %666 = vrot.lane.b32.xlu1 %v649_v35, %s2064_s26  ;;  %664 = vrot.lane.b32.xlu0 %v648_v14, %s2064_s26 }
 0x2d2   : > { %662 = vrot.lane.b32.xlu2 %v647_v39, %s2064_s26 }
 0x2d9   : > { %689 = vperm.xlu0 %1996, %v2143_v4  }
 0x2da   : > { %685 = vperm.xlu2 %1995, %v2133_v0  }
 0x2e1   : > { %1998 = vset.pattern.permute.xlu0 %v2078_v26 }
 0x2e2   : > { %1997 = vset.pattern.permute.xlu2 %v2078_v26 }
 0x314   : > { %v2408_v15 = vpop.permute.xlu2 %656 }
 0x315   : > { %3288 = vst [vmem:[#allocation16_spill] sm:$0xff] %v2408_v15 }
 0x32b   : > { %v2420_v29 = vpop.permute.xlu0 %658 }
 0x32c   : > { %v2412_v18 = vpop.permute.xlu2 %662  ;;  %3290 = vst [vmem:[#allocation18_spill] sm:$0xff] %v2420_v29 }
 0x334   : > { %v686_v35 = vpop.permute.xlu2 %685 }
 0x335   : > { %v692_v14 = vmul.f32 %v686_v35, %v2386_v10  ;;  %v693_v39 = vmul.f32 %v686_v35, %v2384_v56  ;;  %v694_v15 = vmul.f32 %v686_v35, %v2382_v51 }
 0x337   : > { %704 = vrot.lane.b32.xlu1 %v692_v14, %s2065_s27  ;;  %706 = vrot.lane.b32.xlu2 %v693_v39, %s2065_s27  ;;  %v2079_v14 = vmov 13  }
 0x33f   : > { %708 = vrot.lane.b32.xlu1 %v694_v15, %s2065_s27 }
 0x343   : > { %v2424_v53 = vpop.permute.xlu0 %664 }
 0x34b   : > { %v690_v26 = vpop.permute.xlu0 %689 }
 0x34c   : > { %v695_v50 = vmul.f32 %v690_v26, %v2386_v10  ;;  %v696_v36 = vmul.f32 %v690_v26, %v2384_v56  ;;  %v697_v21 = vmul.f32 %v690_v26, %v2382_v51 }
 0x34e   : > { %714 = vrot.lane.b32.xlu1 %v697_v21, %s2065_s27  ;;  %712 = vrot.lane.b32.xlu0 %v696_v36, %s2065_s27 }
 0x34f   : > { %710 = vrot.lane.b32.xlu2 %v695_v50, %s2065_s27 }
 0x356   : > { %737 = vperm.xlu0 %1998, %v2143_v4  }
 0x357   : > { %733 = vperm.xlu2 %1997, %v2133_v0  }
 0x35e   : > { %2000 = vset.pattern.permute.xlu0 %v2079_v14 }
 0x35f   : > { %1999 = vset.pattern.permute.xlu2 %v2079_v14 }
 0x391   : > { %v2434_v15 = vpop.permute.xlu2 %706 }
 0x392   : > { %3291 = vst [vmem:[#allocation19_spill] sm:$0xff] %v2434_v15 }
 0x3a9   : > { %v2436_v35 = vpop.permute.xlu2 %710 }
 0x3b1   : > { %v734_v39 = vpop.permute.xlu2 %733 }
 0x3b2   : > { %v740_v26 = vmul.f32 %v734_v39, %v2386_v10  ;;  %v741_v21 = vmul.f32 %v734_v39, %v2384_v56  ;;  %v742_v36 = vmul.f32 %v734_v39, %v2382_v51  ;;  %v2454_v39 = vpop.permute.xlu1 %660 }
 0x3b3   : > { %3292 = vst [vmem:[#allocation20_spill] sm:$0xff] %v2454_v39  ;;  %v250_v39 = vsel %vm247_vm0, %v2253_v62, %v2251_v61 }
 0x3b4   : > { %752 = vrot.lane.b32.xlu1 %v740_v26, %s2067_s28  ;;  %754 = vrot.lane.b32.xlu2 %v741_v21, %s2067_s28 }
 0x3ba   : > { %v2456_v26 = vpop.permute.xlu1 %666 }
 0x3bc   : > { %756 = vrot.lane.b32.xlu1 %v742_v36, %s2067_s28 }
 0x3c0   : > { %v2444_v50 = vpop.permute.xlu0 %712 }
 0x3c2   : > { %v2458_v21 = vpop.permute.xlu1 %704 }
 0x3c3   : > { %3293 = vst [vmem:[#allocation21_spill] sm:$0xff] %v2458_v21  ;;  %v251_v21 = vsel %vm247_vm0, %v2251_v61, %v2315_v42  ;;  %v348_v61 = vsel %vm345_vm2, %v2261_v3, %v2267_v7  ;;  %v2080_v42 = vmov 14   ;;  %v398_v3 = vsel %vm394_vm3, %v2277_v17, %v2339_v57 }
 0x3c8   : > { %v738_v15 = vpop.permute.xlu0 %737 }
 0x3c9   : > { %v743_v29 = vmul.f32 %v738_v15, %v2386_v10  ;;  %v744_v14 = vmul.f32 %v738_v15, %v2384_v56  ;;  %v745_v30 = vmul.f32 %v738_v15, %v2382_v51  ;;  %v206_v15 = vmul.f32 %v2175_v13, %v2195_v25 }
 0x3ca   : > { %v2462_v33 = vpop.permute.xlu1 %708 }
 0x3cb   : > { %760 = vrot.lane.b32.xlu0 %v744_v14, %s2067_s28  ;;  %758 = vrot.lane.b32.xlu2 %v743_v29, %s2067_s28  ;;  %3295 = vst [vmem:[#allocation23_spill] sm:$0xff] %v2462_v33 }
 0x3cc   : > { %762 = vrot.lane.b32.xlu1 %v745_v30, %s2067_s28  ;;  %v207_v30 = vmul.f32 %v2173_v12, %v2195_v25  ;;  %v299_v25 = vsel %vm296_vm1, %v2257_v1, %v2259_v2  ;;  %v397_v2 = vsel %vm394_vm3, %v2265_v6, %v2277_v17  ;;  %v447_v6 = vsel %vm443_vm4, %v2283_v20, %v2361_v28 }
 0x3cd   : > { %v495_v17 = vsel %vm492_vm5, %v2297_v32, %v2295_v31  ;;  %v545_v32 = vsel %vm541_vm6, %v2337_v55, %v2373_v37 }
 0x3ce   : > { %v213_v33 = vadd.f32 %v207_v30, %v2193_v24  ;;  %v349_v30 = vsel %vm345_vm2, %v2267_v7, %v2327_v48  ;;  %v446_v7 = vsel %vm443_vm4, %v2269_v8, %v2283_v20  ;;  %v544_v20 = vsel %vm541_vm6, %v2335_v54, %v2337_v55 }
 0x3cf   : > { %v627_v54 = vmul.f32 %v2386_v10, %v2398_v58  ;;  %v628_v55 = vmul.f32 %v2384_v56, %v2398_v58 }
 0x3d0   : > { %v262_v62 = vadd.f32 %v251_v21, %v213_v33 }
 0x3d2   : > { %v2468_v29 = vpop.permute.xlu1 %714  ;;  %v311_v1 = vadd.f32 %v300_v19, %v262_v62  ;;  %v496_v62 = vsel %vm492_vm5, %v2295_v31, %v2367_v34 }
 0x3d3   : > { %785 = vperm.xlu0 %2000, %v2143_v4   ;;  %781 = vperm.xlu2 %1999, %v2133_v0   ;;  %3296 = vst [vmem:[#allocation24_spill] sm:$0xff] %v2468_v29 }
 0x3db   : > { %2002 = vset.pattern.permute.xlu0 %v2080_v42  ;;  %2001 = vset.pattern.permute.xlu2 %v2080_v42 }
 0x40e   : > { %v2460_v36 = vpop.permute.xlu2 %754 }
 0x40f   : > { %3294 = vst [vmem:[#allocation22_spill] sm:$0xff] %v2460_v36  ;;  %v212_v36 = vadd.f32 %v206_v15, %v2193_v24 }
 0x411   : > { %v261_v49 = vadd.f32 %v250_v39, %v212_v36 }
 0x413   : > { %v310_v15 = vadd.f32 %v299_v25, %v261_v49  ;;  %v360_v25 = vadd.f32 %v349_v30, %v311_v1  ;;  %v593_v1 = vsel %vm590_vm7, %v2410_v16, %v2396_v38  ;;  %v670_v16 = vsel %vm247_vm0, %v2412_v18, %v2424_v53 }
 0x415   : > { %v359_v33 = vadd.f32 %v348_v61, %v310_v15  ;;  %v409_v36 = vadd.f32 %v398_v3, %v360_v25 }
 0x417   : > { %v408_v21 = vadd.f32 %v397_v2, %v359_v33  ;;  %v458_v61 = vadd.f32 %v447_v6, %v409_v36  ;;  %v594_v33 = vsel %vm590_vm7, %v2396_v38, %v2379_v40  ;;  %v671_v38 = vsel %vm247_vm0, %v2424_v53, %v2456_v26 }
 0x418   : > { %v719_v36 = vsel %vm296_vm1, %v2444_v50, %v2468_v29 }
 0x419   : > { %v457_v8 = vadd.f32 %v446_v7, %v408_v21  ;;  %v507_v30 = vadd.f32 %v496_v62, %v458_v61  ;;  %v718_v21 = vsel %vm296_vm1, %v2436_v35, %v2444_v50 }
 0x41b   : > { %v506_v15 = vadd.f32 %v495_v17, %v457_v8  ;;  %v556_v3 = vadd.f32 %v545_v32, %v507_v30 }
 0x41d   : > { %v555_v31 = vadd.f32 %v544_v20, %v506_v15 }
 0x41f   : > { %v604_v7 = vadd.f32 %v593_v1, %v555_v31  ;;  %v2081_v31 = vmov 15  }
 0x425   : > { %v2470_v14 = vpop.permute.xlu2 %758 }
 0x426   : > { %v2495_v39 = vpop.permute.xlu1 %752 }
 0x42d   : > { %v782_v42 = vpop.permute.xlu2 %781 }
 0x42e   : > { %v788_v19 = vmul.f32 %v782_v42, %v2386_v10  ;;  %v789_v49 = vmul.f32 %v782_v42, %v2384_v56  ;;  %v790_v2 = vmul.f32 %v782_v42, %v2382_v51  ;;  %v2533_v25 = vpop.permute.xlu1 %756  ;;  %v633_v42 = vadd.f32 %v627_v54, %v604_v7 }
 0x430   : > { %800 = vrot.lane.b32.xlu1 %v788_v19, %s2068_s29  ;;  %802 = vrot.lane.b32.xlu2 %v789_v49, %s2068_s29  ;;  %v605_v19 = vadd.f32 %v594_v33, %v556_v3  ;;  %v681_v6 = vadd.f32 %v670_v16, %v633_v42 }
 0x432   : > { %v634_v49 = vadd.f32 %v628_v55, %v605_v19  ;;  %v729_v8 = vadd.f32 %v718_v21, %v681_v6 }
 0x434   : > { %v682_v17 = vadd.f32 %v671_v38, %v634_v49 }
 0x436   : > { %v730_v62 = vadd.f32 %v719_v36, %v682_v17 }
 0x438   : > { %804 = vrot.lane.b32.xlu1 %v790_v2, %s2068_s29 }
 0x43d   : > { %v761_v18 = vpop.permute.xlu0 %760 }
 0x43e   : > { %v766_v61 = vsel %vm345_vm2, %v2470_v14, %v761_v18  ;;  %v2550_v20 = vpop.permute.xlu1 %762 }
 0x43f   : > { %3297 = vst [vmem:[#allocation25_spill] sm:$0xff] %v2550_v20  ;;  %v777_v53 = vadd.f32 %v766_v61, %v729_v8  ;;  %v767_v15 = vsel %vm345_vm2, %v761_v18, %v2550_v20 }
 0x440   : > { %v778_v32 = vadd.f32 %v767_v15, %v730_v62 }
 0x445   : > { %v786_v35 = vpop.permute.xlu0 %785 }
 0x446   : > { %v791_v30 = vmul.f32 %v786_v35, %v2386_v10  ;;  %v792_v1 = vmul.f32 %v786_v35, %v2384_v56  ;;  %v793_v50 = vmul.f32 %v786_v35, %v2382_v51 }
 0x448   : > { %808 = vrot.lane.b32.xlu0 %v792_v1, %s2068_s29  ;;  %806 = vrot.lane.b32.xlu2 %v791_v30, %s2068_s29 }
 0x449   : > { %810 = vrot.lane.b32.xlu1 %v793_v50, %s2068_s29 }
 0x450   : > { %833 = vperm.xlu0 %2002, %v2143_v4   ;;  %829 = vperm.xlu2 %2001, %v2133_v0  }
 0x458   : > { %2004 = vset.pattern.permute.xlu0 %v2081_v31  ;;  %2003 = vset.pattern.permute.xlu2 %v2081_v31 }
 0x48a   : > { %v2562_v14 = vpop.permute.xlu2 %802 }
 0x4a2   : > { %v807_v2 = vpop.permute.xlu2 %806  ;;  %v2564_v33 = vpop.permute.xlu1 %800 }
 0x4aa   : > { %v830_v54 = vpop.permute.xlu2 %829  ;;  %v2571_v19 = vpop.permute.xlu1 %804 }
 0x4ab   : > { %v836_v3 = vmul.f32 %v830_v54, %v2386_v10  ;;  %v837_v55 = vmul.f32 %v830_v54, %v2384_v56  ;;  %v838_v7 = vmul.f32 %v830_v54, %v2382_v51 }
 0x4ad   : > { %848 = vrot.lane.b32.xlu1 %v836_v3, %s2069_s30  ;;  %850 = vrot.lane.b32.xlu2 %v837_v55, %s2069_s30 }
 0x4b5   : > { %852 = vrot.lane.b32.xlu1 %v838_v7, %s2069_s30 }
 0x4ba   : > { %v809_v16 = vpop.permute.xlu0 %808 }
 0x4bb   : > { %v814_v42 = vsel %vm394_vm3, %v807_v2, %v809_v16  ;;  %v2575_v38 = vpop.permute.xlu1 %810 }
 0x4bc   : > { %3298 = vst [vmem:[#allocation26_spill] sm:$0xff] %v2575_v38  ;;  %v825_v49 = vadd.f32 %v814_v42, %v777_v53  ;;  %v815_v21 = vsel %vm394_vm3, %v809_v16, %v2575_v38  ;;  %v2082_v53 = vmov 16  }
 0x4bd   : > { %v826_v6 = vadd.f32 %v815_v21, %v778_v32 }
 0x4c2   : > { %v834_v36 = vpop.permute.xlu0 %833 }
 0x4c3   : > { %v839_v17 = vmul.f32 %v834_v36, %v2386_v10  ;;  %v840_v8 = vmul.f32 %v834_v36, %v2384_v56  ;;  %v841_v18 = vmul.f32 %v834_v36, %v2382_v51 }
 0x4c5   : > { %856 = vrot.lane.b32.xlu0 %v840_v8, %s2069_s30  ;;  %854 = vrot.lane.b32.xlu2 %v839_v17, %s2069_s30  ;;  %v2083_v17 = vmov 17  }
 0x4c6   : > { %858 = vrot.lane.b32.xlu1 %v841_v18, %s2069_s30 }
 0x4cd   : > { %881 = vperm.xlu0 %2004, %v2143_v4   ;;  %877 = vperm.xlu2 %2003, %v2133_v0  }
 0x4d5   : > { %2006 = vset.pattern.permute.xlu0 %v2082_v53  ;;  %2005 = vset.pattern.permute.xlu2 %v2082_v53 }
 0x507   : > { %v2587_v62 = vpop.permute.xlu2 %850 }
 0x51f   : > { %v855_v61 = vpop.permute.xlu2 %854  ;;  %v2589_v15 = vpop.permute.xlu1 %848 }
 0x527   : > { %v878_v32 = vpop.permute.xlu2 %877  ;;  %v2596_v50 = vpop.permute.xlu1 %852 }
 0x528   : > { %v884_v35 = vmul.f32 %v878_v32, %v2386_v10  ;;  %v885_v30 = vmul.f32 %v878_v32, %v2384_v56  ;;  %v886_v1 = vmul.f32 %v878_v32, %v2382_v51 }
 0x52a   : > { %896 = vrot.lane.b32.xlu1 %v884_v35, %s2071_s4  ;;  %898 = vrot.lane.b32.xlu2 %v885_v30, %s2071_s4 }
 0x532   : > { %900 = vrot.lane.b32.xlu1 %v886_v1, %s2071_s4 }
 0x537   : > { %v857_v2 = vpop.permute.xlu0 %856 }
 0x538   : > { %v862_v31 = vsel %vm443_vm4, %v855_v61, %v857_v2  ;;  %v2600_v54 = vpop.permute.xlu1 %858 }
 0x539   : > { %3299 = vst [vmem:[#allocation27_spill] sm:$0xff] %v2600_v54  ;;  %v873_v3 = vadd.f32 %v862_v31, %v825_v49  ;;  %v863_v55 = vsel %vm443_vm4, %v857_v2, %v2600_v54 }
 0x53a   : > { %v874_v7 = vadd.f32 %v863_v55, %v826_v6 }
 0x53f   : > { %v882_v16 = vpop.permute.xlu0 %881 }
 0x540   : > { %v887_v42 = vmul.f32 %v882_v16, %v2386_v10  ;;  %v888_v21 = vmul.f32 %v882_v16, %v2384_v56  ;;  %v889_v36 = vmul.f32 %v882_v16, %v2382_v51 }
 0x542   : > { %904 = vrot.lane.b32.xlu0 %v888_v21, %s2071_s4  ;;  %902 = vrot.lane.b32.xlu2 %v887_v42, %s2071_s4 }
 0x543   : > { %906 = vrot.lane.b32.xlu1 %v889_v36, %s2071_s4 }
 0x54a   : > { %929 = vperm.xlu0 %2006, %v2143_v4   ;;  %925 = vperm.xlu2 %2005, %v2133_v0  }
 0x552   : > { %2008 = vset.pattern.permute.xlu0 %v2083_v17  ;;  %2007 = vset.pattern.permute.xlu2 %v2083_v17 }
 0x584   : > { %v2612_v49 = vpop.permute.xlu2 %898 }
 0x59c   : > { %v903_v6 = vpop.permute.xlu2 %902  ;;  %v2614_v8 = vpop.permute.xlu1 %896 }
 0x5a4   : > { %v926_v18 = vpop.permute.xlu2 %925  ;;  %v2621_v35 = vpop.permute.xlu1 %900 }
 0x5a5   : > { %v932_v61 = vmul.f32 %v926_v18, %v2386_v10  ;;  %v933_v53 = vmul.f32 %v926_v18, %v2384_v56  ;;  %v934_v32 = vmul.f32 %v926_v18, %v2382_v51  ;;  %v2085_v18 = vmov 18  }
 0x5a7   : > { %944 = vrot.lane.b32.xlu1 %v932_v61, %s2073_s5  ;;  %946 = vrot.lane.b32.xlu2 %v933_v53, %s2073_s5 }
 0x5af   : > { %948 = vrot.lane.b32.xlu1 %v934_v32, %s2073_s5 }
 0x5b4   : > { %v905_v30 = vpop.permute.xlu0 %904 }
 0x5b5   : > { %v910_v1 = vsel %vm492_vm5, %v903_v6, %v905_v30  ;;  %v2625_v2 = vpop.permute.xlu1 %906  ;;  %v2084_v6 = vmov 19  }
 0x5b6   : > { %3300 = vst [vmem:[#allocation28_spill] sm:$0xff] %v2625_v2  ;;  %v921_v31 = vadd.f32 %v910_v1, %v873_v3  ;;  %v911_v55 = vsel %vm492_vm5, %v905_v30, %v2625_v2  ;;  %2011 = vset.pattern.permute.xlu1 %v2084_v6 }
 0x5b7   : > { %v922_v16 = vadd.f32 %v911_v55, %v874_v7 }
 0x5bc   : > { %v930_v42 = vpop.permute.xlu0 %929 }
 0x5bd   : > { %v935_v21 = vmul.f32 %v930_v42, %v2386_v10  ;;  %v936_v36 = vmul.f32 %v930_v42, %v2384_v56  ;;  %v937_v17 = vmul.f32 %v930_v42, %v2382_v51 }
 0x5bf   : > { %952 = vrot.lane.b32.xlu0 %v936_v36, %s2073_s5  ;;  %950 = vrot.lane.b32.xlu2 %v935_v21, %s2073_s5 }
 0x5c0   : > { %954 = vrot.lane.b32.xlu1 %v937_v17, %s2073_s5 }
 0x5c7   : > { %977 = vperm.xlu0 %2008, %v2143_v4   ;;  %973 = vperm.xlu2 %2007, %v2133_v0  }
 0x5cf   : > { %2010 = vset.pattern.permute.xlu0 %v2085_v18  ;;  %2009 = vset.pattern.permute.xlu2 %v2085_v18 }
 0x601   : > { %v2637_v3 = vpop.permute.xlu2 %946 }
 0x619   : > { %v951_v7 = vpop.permute.xlu2 %950  ;;  %v2639_v61 = vpop.permute.xlu1 %944 }
 0x621   : > { %v974_v53 = vpop.permute.xlu2 %973  ;;  %v2646_v1 = vpop.permute.xlu1 %948 }
 0x622   : > { %v980_v32 = vmul.f32 %v974_v53, %v2386_v10  ;;  %v981_v30 = vmul.f32 %v974_v53, %v2384_v56  ;;  %v982_v0 = vmul.f32 %v974_v53, %v2382_v51 }
 0x624   : > { %992 = vrot.lane.b32.xlu1 %v980_v32, %s2076_s6  ;;  %994 = vrot.lane.b32.xlu2 %v981_v30, %s2076_s6 }
 0x62c   : > { %996 = vrot.lane.b32.xlu1 %v982_v0, %s2076_s6 }
 0x631   : > { %v953_v55 = vpop.permute.xlu0 %952 }
 0x632   : > { %v958_v42 = vsel %vm541_vm6, %v951_v7, %v953_v55  ;;  %v2650_v21 = vpop.permute.xlu1 %954  ;;  %v2086_v7 = vmov 20  }
 0x633   : > { %3301 = vst [vmem:[#allocation29_spill] sm:$0xff] %v2650_v21  ;;  %v969_v36 = vadd.f32 %v958_v42, %v921_v31  ;;  %v959_v17 = vsel %vm541_vm6, %v953_v55, %v2650_v21  ;;  %v2664_v31 = vld [vmem:[%s3248_s0] sm:$0xff] }
 0x634   : > { %v970_v18 = vadd.f32 %v959_v17, %v922_v16 }
 0x639   : > { %v978_v2 = vpop.permute.xlu0 %977 }
 0x63a   : > { %v983_v32 = vmul.f32 %v978_v2, %v2386_v10  ;;  %v984_v30 = vmul.f32 %v978_v2, %v2384_v56  ;;  %v985_v53 = vmul.f32 %v978_v2, %v2382_v51 }
 0x63c   : > { %1000 = vrot.lane.b32.xlu0 %v984_v30, %s2076_s6  ;;  %998 = vrot.lane.b32.xlu2 %v983_v32, %s2076_s6 }
 0x63d   : > { %1002 = vrot.lane.b32.xlu1 %v985_v53, %s2076_s6  ;;  %v1916_v53 = vld [vmem:[%s2168_s25 + $0x2] ss:$4 sm:$0x7] }
 0x63e   : > { %v2687_v54 = vperm.slane %v1916_v53, 0  ;;  %v2691_v38 = vperm.slane %v1916_v53, 2 }
 0x644   : > { %1027 = vperm.xlu0 %2010, %v2143_v4   ;;  %1023 = vperm.xlu2 %2009, %v2664_v31  }
 0x645   : > { %1050 = vperm.xlu1 %2011, %v2664_v31  }
 0x64c   : > { %2012 = vset.pattern.permute.xlu2 %v2084_v6 }
 0x64d   : > { %1054 = vperm.xlu2 %2012, %v2143_v4   ;;  %2013 = vset.pattern.permute.xlu1 %v2086_v7 }
 0x655   : > { %2014 = vset.pattern.permute.xlu2 %v2086_v7  ;;  %v2689_v7 = vperm.slane %v1916_v53, 1 }
 0x67e   : > { %v2671_v16 = vpop.permute.xlu2 %994 }
 0x696   : > { %v2669_v2 = vpop.permute.xlu1 %992  ;;  %v999_v55 = vpop.permute.xlu2 %998 }
 0x69e   : > { %v2673_v0 = vpop.permute.xlu1 %996  ;;  %v2685_v21 = vpop.permute.xlu2 %1023 }
 0x6ae   : > { %v1001_v42 = vpop.permute.xlu0 %1000 }
 0x6af   : > { %v1006_v17 = vsel %vm590_vm7, %v999_v55, %v1001_v42  ;;  %v2676_v32 = vpop.permute.xlu1 %1002 }
 0x6b0   : > { %3302 = vst [vmem:[#allocation30_spill] sm:$0xff] %v2676_v32  ;;  %v2678_v30 = vadd.f32 %v1006_v17, %v969_v36  ;;  %v1007_v4 = vsel %vm590_vm7, %v1001_v42, %v2676_v32  ;;  %v298_v32 = vsel %vm296_vm1, %v2255_v63, %v2319_v44 }
 0x6b1   : > { %v2682_v6 = vadd.f32 %v1007_v4, %v970_v18  ;;  %v1055_v18 = vpop.permute.xlu2 %1054 }
 0x6b2   : > { %v1061_v42 = vmul.f32 %v1055_v18, %v2689_v7  ;;  %v1062_v4 = vmul.f32 %v1055_v18, %v2691_v38  ;;  %v1060_v53 = vmul.f32 %v1055_v18, %v2687_v54 }
 0x6b7   : > { %v1051_v20 = vpop.permute.xlu1 %1050 }
 0x6b8   : > { %v1057_v55 = vmul.f32 %v1051_v20, %v2687_v54  ;;  %v1058_v36 = vmul.f32 %v1051_v20, %v2689_v7  ;;  %v1059_v17 = vmul.f32 %v1051_v20, %v2691_v38  ;;  %v2708_v20 = vld [vmem:[%s3248_s0 + $0x8] sm:$0xff] }
 0x6ba   : > { %1073 = vrot.lane.b32.xlu0 %v1059_v17, %s2064_s26  ;;  %1071 = vrot.lane.b32.xlu2 %v1058_v36, %s2064_s26  ;;  %v204_v36 = vmul.f32 %v2173_v12, %v2189_v22  ;;  %v203_v17 = vmul.f32 %v2175_v13, %v2189_v22  ;;  %v248_v12 = vsel %vm247_vm0, %v2249_v60, %v2247_v59 }
 0x6bb   : > { %1069 = vrot.lane.b32.xlu1 %v1057_v55, %s2064_s26  ;;  %v205_v55 = vmul.f32 %v2171_v11, %v2189_v22 }
 0x6bc   : > { %v209_v13 = vadd.f32 %v203_v17, %v2191_v23 }
 0x6bd   : > { %v211_v18 = vadd.f32 %v205_v55, %v2191_v23  ;;  %v347_v55 = vsel %vm345_vm2, %v2263_v5, %v2325_v47 }
 0x6c2   : > { %1079 = vrot.lane.b32.xlu0 %v1062_v4, %s2064_s26  ;;  %1077 = vrot.lane.b32.xlu2 %v1061_v42, %s2064_s26  ;;  %v249_v42 = vsel %vm247_vm0, %v2247_v59, %v2313_v41  ;;  %v210_v4 = vadd.f32 %v204_v36, %v2191_v23  ;;  %v396_v59 = vsel %vm394_vm3, %v2271_v9, %v2331_v52 }
 0x6c3   : > { %1075 = vrot.lane.b32.xlu1 %v1060_v53, %s2064_s26  ;;  %v260_v53 = vadd.f32 %v2313_v41, %v211_v18  ;;  %v297_v41 = vsel %vm296_vm1, %v2317_v43, %v2255_v63  ;;  %v258_v18 = vadd.f32 %v248_v12, %v209_v13  ;;  %v346_v23 = vsel %vm345_vm2, %v2323_v46, %v2263_v5  ;;  %v3304_v43 = vld [vmem:[#allocation6_spill] sm:$0xff]  ;;  %v3306_v13 = vld [vmem:[#allocation4_spill] sm:$0xff] }
 0x6c4   : > { %v259_v29 = vadd.f32 %v249_v42, %v210_v4  ;;  %v3303_v4 = vld [vmem:[#allocation3_spill] sm:$0xff]  ;;  %v3305_v12 = vld [vmem:[#allocation10_spill] sm:$0xff]  ;;  %v3307_v46 = vld [vmem:[#allocation8_spill] sm:$0xff] }
 0x6c5   : > { %v309_v22 = vadd.f32 %v2319_v44, %v260_v53  ;;  %v307_v44 = vadd.f32 %v297_v41, %v258_v18  ;;  %v445_v63 = vsel %vm443_vm4, %v3303_v4, %v2357_v27  ;;  %v494_v5 = vsel %vm492_vm5, %v3306_v13, %v3305_v12  ;;  %v3309_v18 = vld [vmem:[#allocation7_spill] sm:$0xff] }
 0x6c6   : > { %v308_v36 = vadd.f32 %v298_v32, %v259_v29 }
 0x6c7   : > { %v358_v42 = vadd.f32 %v2325_v47, %v309_v22  ;;  %v395_v47 = vsel %vm394_vm3, %v3304_v43, %v2271_v9  ;;  %v356_v32 = vadd.f32 %v346_v23, %v307_v44  ;;  %v3311_v44 = vld [vmem:[#allocation14_spill] sm:$0xff] }
 0x6c8   : > { %v357_v60 = vadd.f32 %v347_v55, %v308_v36  ;;  %v3308_v36 = vld [vmem:[#allocation12_spill] sm:$0xff] }
 0x6c9   : > { %v407_v17 = vadd.f32 %v2331_v52, %v358_v42  ;;  %v444_v52 = vsel %vm443_vm4, %v3307_v46, %v3303_v4  ;;  %v405_v55 = vadd.f32 %v395_v47, %v356_v32  ;;  %v543_v9 = vsel %vm541_vm6, %v3309_v18, %v3308_v36  ;;  %v3310_v42 = vld [vmem:[#allocation9_spill] sm:$0xff]  ;;  %v3314_v47 = vld [vmem:[#allocation11_spill] sm:$0xff] }
 0x6ca   : > { %1102 = vperm.xlu2 %2014, %v2708_v20   ;;  %v406_v29 = vadd.f32 %v396_v59, %v357_v60 }
 0x6cb   : > { %1098 = vperm.xlu1 %2013, %v2664_v31   ;;  %v456_v53 = vadd.f32 %v2357_v27, %v407_v17  ;;  %v493_v27 = vsel %vm492_vm5, %v3310_v42, %v3306_v13  ;;  %v454_v23 = vadd.f32 %v444_v52, %v405_v55  ;;  %v3312_v17 = vld [vmem:[#allocation15_spill] sm:$0xff]  ;;  %v3317_v42 = vld [vmem:[#allocation18_spill] sm:$0xff] }
 0x6cc   : > { %v455_v22 = vadd.f32 %v445_v63, %v406_v29  ;;  %v592_v4 = vsel %vm590_vm7, %v3312_v17, %v3311_v44  ;;  %v3313_v63 = vld [vmem:[#allocation17_spill] sm:$0xff]  ;;  %v542_v29 = vsel %vm541_vm6, %v3314_v47, %v3309_v18 }
 0x6cd   : > { %v505_v41 = vadd.f32 %v3305_v12, %v456_v53  ;;  %v626_v43 = vmul.f32 %v2382_v51, %v3313_v63  ;;  %v625_v53 = vmul.f32 %v2384_v56, %v3313_v63  ;;  %v503_v12 = vadd.f32 %v493_v27, %v454_v23  ;;  %v3318_v27 = vld [vmem:[#allocation23_spill] sm:$0xff] }
 0x6ce   : > { %v504_v59 = vadd.f32 %v494_v5, %v455_v22  ;;  %v3315_v5 = vld [vmem:[#allocation13_spill] sm:$0xff]  ;;  %v624_v55 = vmul.f32 %v2386_v10, %v3313_v63  ;;  %v3319_v23 = vld [vmem:[#allocation19_spill] sm:$0xff]  ;;  %v3321_v63 = vld [vmem:[#allocation22_spill] sm:$0xff] }
 0x6cf   : > { %v554_v60 = vadd.f32 %v3308_v36, %v505_v41  ;;  %v591_v46 = vsel %vm590_vm7, %v3315_v5, %v3312_v17  ;;  %v552_v22 = vadd.f32 %v542_v29, %v503_v12  ;;  %v3316_v36 = vld [vmem:[#allocation20_spill] sm:$0xff]  ;;  %v3322_v29 = vld [vmem:[#allocation21_spill] sm:$0xff]  ;;  %v813_v5 = vsel %vm394_vm3, %v2562_v14, %v2571_v19 }
 0x6d0   : > { %v553_v32 = vadd.f32 %v543_v9, %v504_v59  ;;  %v669_v18 = vsel %vm247_vm0, %v3317_v42, %v3316_v36 }
 0x6d1   : > { %v603_v13 = vadd.f32 %v3311_v44, %v554_v60  ;;  %v601_v59 = vadd.f32 %v591_v46, %v552_v22  ;;  %v717_v60 = vsel %vm296_vm1, %v3319_v23, %v3318_v27  ;;  %v3320_v44 = vld [vmem:[#allocation16_spill] sm:$0xff]  ;;  %v764_v46 = vsel %vm345_vm2, %v2495_v39, %v3321_v63 }
 0x6d2   : > { %v602_v52 = vadd.f32 %v592_v4, %v553_v32  ;;  %v668_v17 = vsel %vm247_vm0, %v3320_v44, %v3317_v42  ;;  %v716_v32 = vsel %vm296_vm1, %v3322_v29, %v3319_v23  ;;  %v909_v39 = vsel %vm492_vm5, %v2612_v49, %v2621_v35 }
 0x6d3   : > { %v632_v41 = vadd.f32 %v626_v43, %v603_v13  ;;  %v630_v47 = vadd.f32 %v624_v55, %v601_v59  ;;  %v765_v43 = vsel %vm345_vm2, %v3321_v63, %v2533_v25 }
 0x6d4   : > { %v631_v9 = vadd.f32 %v625_v53, %v602_v52 }
 0x6d5   : > { %v680_v56 = vadd.f32 %v3316_v36, %v632_v41  ;;  %v678_v12 = vadd.f32 %v668_v17, %v630_v47  ;;  %v861_v41 = vsel %vm443_vm4, %v2587_v62, %v2596_v50  ;;  %v1039_v17 = vmul.f32 %v2691_v38, %v2685_v21 }
 0x6d6   : > { %v679_v4 = vadd.f32 %v669_v18, %v631_v9 }
 0x6d7   : > { %v728_v10 = vadd.f32 %v3318_v27, %v680_v56  ;;  %v726_v22 = vadd.f32 %v716_v32, %v678_v12  ;;  %v2828_v27 = vpop.permute.xlu0 %1027 }
 0x6d8   : > { %v727_v53 = vadd.f32 %v717_v60, %v679_v4 }
 0x6d9   : > { %v776_v13 = vadd.f32 %v2533_v25, %v728_v10  ;;  %v812_v25 = vsel %vm394_vm3, %v2564_v33, %v2562_v14  ;;  %v774_v42 = vadd.f32 %v764_v46, %v726_v22  ;;  %v957_v14 = vsel %vm541_vm6, %v2637_v3, %v2646_v1 }
 0x6da   : > { %v775_v52 = vadd.f32 %v765_v43, %v727_v53  ;;  %v908_v33 = vsel %vm492_vm5, %v2614_v8, %v2612_v49  ;;  %v1004_v8 = vsel %vm590_vm7, %v2669_v2, %v2671_v16  ;;  %v1037_v10 = vmul.f32 %v2687_v54, %v2685_v21 }
 0x6db   : > { %v824_v55 = vadd.f32 %v2571_v19, %v776_v13  ;;  %v860_v19 = vsel %vm443_vm4, %v2589_v15, %v2587_v62  ;;  %v822_v59 = vadd.f32 %v812_v25, %v774_v42  ;;  %v1005_v62 = vsel %vm590_vm7, %v2671_v16, %v2673_v0 }
 0x6dc   : > { %v823_v36 = vadd.f32 %v813_v5, %v775_v52  ;;  %v956_v15 = vsel %vm541_vm6, %v2639_v61, %v2637_v3  ;;  %v2087_v61 = vmov 21   ;;  %v1040_v46 = vmul.f32 %v2687_v54, %v2828_v27 }
 0x6dd   : > { %v872_v18 = vadd.f32 %v2596_v50, %v824_v55  ;;  %v870_v23 = vadd.f32 %v860_v19, %v822_v59  ;;  %2015 = vset.pattern.permute.xlu0 %v2087_v61  ;;  %2016 = vset.pattern.permute.xlu1 %v2087_v61 }
 0x6de   : > { %v871_v9 = vadd.f32 %v861_v41, %v823_v36  ;;  %v1046_v36 = vadd.f32 %v1040_v46, %v2678_v30 }
 0x6df   : > { %v920_v56 = vadd.f32 %v2621_v35, %v872_v18  ;;  %v918_v44 = vadd.f32 %v908_v33, %v870_v23 }
 0x6e0   : > { %v919_v50 = vadd.f32 %v909_v39, %v871_v9 }
 0x6e1   : > { %v968_v60 = vadd.f32 %v2646_v1, %v920_v56  ;;  %v1038_v1 = vmul.f32 %v2689_v7, %v2685_v21  ;;  %v966_v47 = vadd.f32 %v956_v15, %v918_v44  ;;  %v1041_v21 = vmul.f32 %v2689_v7, %v2828_v27 }
 0x6e2   : > { %v967_v35 = vadd.f32 %v957_v14, %v919_v50 }
 0x6e3   : > { %v1016_v49 = vadd.f32 %v2673_v0, %v968_v60  ;;  %v1014_v63 = vadd.f32 %v1004_v8, %v966_v47  ;;  %v1047_v22 = vadd.f32 %v1041_v21, %v2682_v6  ;;  %v2088_v60 = vmov 22  }
 0x6e4   : > { %v1015_v4 = vadd.f32 %v1005_v62, %v967_v35  ;;  %v2089_v21 = vmov 23  }
 0x6e5   : > { %v1045_v43 = vadd.f32 %v1039_v17, %v1016_v49  ;;  %v1043_v16 = vadd.f32 %v1037_v10, %v1014_v63 }
 0x6e6   : > { %v1044_v29 = vadd.f32 %v1038_v1, %v1015_v4 }
 0x714   : > { %v1072_v3 = vpop.permute.xlu2 %1071 }
 0x71c   : > { %v1078_v52 = vpop.permute.xlu2 %1077 }
 0x724   : > { %v1103_v6 = vpop.permute.xlu2 %1102 }
 0x725   : > { %v1109_v30 = vmul.f32 %v1103_v6, %v2689_v7  ;;  %v1110_v14 = vmul.f32 %v1103_v6, %v2691_v38  ;;  %v1108_v33 = vmul.f32 %v1103_v6, %v2687_v54 }
 0x72c   : > { %v1074_v0 = vpop.permute.xlu0 %1073 }
 0x72d   : > { %v1082_v32 = vsel %vm247_vm0, %v1072_v3, %v1074_v0  ;;  %v1093_v53 = vadd.f32 %v1074_v0, %v1045_v43  ;;  %v1070_v2 = vpop.permute.xlu1 %1069 }
 0x72e   : > { %v1092_v12 = vadd.f32 %v1082_v32, %v1044_v29  ;;  %v1081_v13 = vsel %vm247_vm0, %v1070_v2, %v1072_v3 }
 0x72f   : > { %v1091_v5 = vadd.f32 %v1081_v13, %v1043_v16 }
 0x734   : > { %v2854_v55 = vpop.permute.xlu0 %1079 }
 0x735   : > { %v1084_v41 = vsel %vm247_vm0, %v1078_v52, %v2854_v55  ;;  %v1076_v25 = vpop.permute.xlu1 %1075 }
 0x736   : > { %v1095_v42 = vadd.f32 %v1084_v41, %v1047_v22  ;;  %v1083_v18 = vsel %vm247_vm0, %v1076_v25, %v1078_v52 }
 0x737   : > { %v1094_v39 = vadd.f32 %v1083_v18, %v1046_v36 }
 0x73d   : > { %v1099_v19 = vpop.permute.xlu1 %1098 }
 0x73e   : > { %v1105_v9 = vmul.f32 %v1099_v19, %v2687_v54  ;;  %v1106_v59 = vmul.f32 %v1099_v19, %v2689_v7  ;;  %v1107_v56 = vmul.f32 %v1099_v19, %v2691_v38 }
 0x740   : > { %1121 = vrot.lane.b32.xlu2 %v1107_v56, %s2065_s27  ;;  %1119 = vrot.lane.b32.xlu1 %v1106_v59, %s2065_s27 }
 0x741   : > { %1117 = vrot.lane.b32.xlu0 %v1105_v9, %s2065_s27 }
 0x748   : > { %1127 = vrot.lane.b32.xlu2 %v1110_v14, %s2065_s27  ;;  %1125 = vrot.lane.b32.xlu1 %v1109_v30, %s2065_s27 }
 0x749   : > { %1123 = vrot.lane.b32.xlu0 %v1108_v33, %s2065_s27 }
 0x750   : > { %1150 = vperm.xlu1 %2016, %v2708_v20  }
 0x751   : > { %1146 = vperm.xlu0 %2015, %v2664_v31  }
 0x758   : > { %2018 = vset.pattern.permute.xlu1 %v2088_v60 }
 0x759   : > { %2017 = vset.pattern.permute.xlu0 %v2088_v60 }
 0x79a   : > { %v1122_v50 = vpop.permute.xlu2 %1121 }
 0x79b   : > { %v1141_v23 = vadd.f32 %v1122_v50, %v1093_v53 }
 0x7a2   : > { %v2876_v8 = vpop.permute.xlu2 %1127 }
 0x7b2   : > { %v1120_v62 = vpop.permute.xlu1 %1119 }
 0x7b3   : > { %v1130_v15 = vsel %vm296_vm1, %v1120_v62, %v1122_v50  ;;  %v1118_v35 = vpop.permute.xlu0 %1117 }
 0x7b4   : > { %v1140_v44 = vadd.f32 %v1130_v15, %v1092_v12  ;;  %v1129_v17 = vsel %vm296_vm1, %v1118_v35, %v1120_v62 }
 0x7b5   : > { %v1139_v49 = vadd.f32 %v1129_v17, %v1091_v5 }
 0x7ba   : > { %v1126_v1 = vpop.permute.xlu1 %1125 }
 0x7bb   : > { %v1132_v4 = vsel %vm296_vm1, %v1126_v1, %v2876_v8  ;;  %v1124_v47 = vpop.permute.xlu0 %1123 }
 0x7bc   : > { %v1143_v10 = vadd.f32 %v1132_v4, %v1095_v42  ;;  %v1131_v3 = vsel %vm296_vm1, %v1124_v47, %v1126_v1 }
 0x7bd   : > { %v1142_v61 = vadd.f32 %v1131_v3, %v1094_v39 }
 0x7c2   : > { %v1151_v63 = vpop.permute.xlu1 %1150 }
 0x7c3   : > { %v1156_v43 = vmul.f32 %v1151_v63, %v2687_v54  ;;  %v1147_v29 = vpop.permute.xlu0 %1146  ;;  %v1157_v53 = vmul.f32 %v1151_v63, %v2689_v7  ;;  %v1158_v16 = vmul.f32 %v1151_v63, %v2691_v38 }
 0x7c4   : > { %v1153_v0 = vmul.f32 %v1147_v29, %v2687_v54  ;;  %v1154_v32 = vmul.f32 %v1147_v29, %v2689_v7  ;;  %v1155_v2 = vmul.f32 %v1147_v29, %v2691_v38 }
 0x7c5   : > { %1171 = vrot.lane.b32.xlu0 %v1156_v43, %s2067_s28 }
 0x7c6   : > { %1167 = vrot.lane.b32.xlu1 %v1154_v32, %s2067_s28  ;;  %1165 = vrot.lane.b32.xlu2 %v1153_v0, %s2067_s28 }
 0x7cd   : > { %1194 = vperm.xlu0 %2017, %v2664_v31  }
 0x7ce   : > { %1173 = vrot.lane.b32.xlu1 %v1157_v53, %s2067_s28  ;;  %1169 = vrot.lane.b32.xlu2 %v1155_v2, %s2067_s28 }
 0x7d5   : > { %2019 = vset.pattern.permute.xlu0 %v2089_v21 }
 0x7d6   : > { %1198 = vperm.xlu1 %2018, %v2708_v20   ;;  %1175 = vrot.lane.b32.xlu2 %v1158_v16, %s2067_s28 }
 0x7de   : > { %2020 = vset.pattern.permute.xlu1 %v2089_v21 }
 0x820   : > { %v1166_v12 = vpop.permute.xlu2 %1165 }
 0x828   : > { %v1170_v13 = vpop.permute.xlu2 %1169 }
 0x829   : > { %v1189_v5 = vadd.f32 %v1170_v13, %v1141_v23 }
 0x830   : > { %v2897_v18 = vpop.permute.xlu2 %1175 }
 0x837   : > { %v1172_v46 = vpop.permute.xlu0 %1171 }
 0x838   : > { %v1168_v52 = vpop.permute.xlu1 %1167 }
 0x839   : > { %v1177_v22 = vsel %vm345_vm2, %v1166_v12, %v1168_v52  ;;  %v1178_v41 = vsel %vm345_vm2, %v1168_v52, %v1170_v13 }
 0x83a   : > { %v1187_v25 = vadd.f32 %v1177_v22, %v1139_v49  ;;  %v1188_v36 = vadd.f32 %v1178_v41, %v1140_v44  ;;  %v2090_v44 = vmov 24   ;;  %v2091_v41 = vmov 25  }
 0x83f   : > { %v1195_v42 = vpop.permute.xlu0 %1194 }
 0x840   : > { %v1174_v39 = vpop.permute.xlu1 %1173  ;;  %v1201_v19 = vmul.f32 %v1195_v42, %v2687_v54  ;;  %v1202_v9 = vmul.f32 %v1195_v42, %v2689_v7  ;;  %v1203_v14 = vmul.f32 %v1195_v42, %v2691_v38 }
 0x841   : > { %v1179_v59 = vsel %vm345_vm2, %v1172_v46, %v1174_v39  ;;  %v1180_v56 = vsel %vm345_vm2, %v1174_v39, %v2897_v18 }
 0x842   : > { %v1190_v6 = vadd.f32 %v1179_v59, %v1142_v61  ;;  %v1191_v30 = vadd.f32 %v1180_v56, %v1143_v10  ;;  %1215 = vrot.lane.b32.xlu1 %v1202_v9, %s2068_s29  ;;  %1213 = vrot.lane.b32.xlu2 %v1201_v19, %s2068_s29 }
 0x848   : > { %v1199_v33 = vpop.permute.xlu1 %1198 }
 0x849   : > { %v1204_v50 = vmul.f32 %v1199_v33, %v2687_v54  ;;  %v1205_v23 = vmul.f32 %v1199_v33, %v2689_v7  ;;  %v1206_v60 = vmul.f32 %v1199_v33, %v2691_v38 }
 0x84a   : > { %1217 = vrot.lane.b32.xlu2 %v1203_v14, %s2068_s29 }
 0x84b   : > { %1219 = vrot.lane.b32.xlu0 %v1204_v50, %s2068_s29  ;;  %1221 = vrot.lane.b32.xlu1 %v1205_v23, %s2068_s29 }
 0x852   : > { %1223 = vrot.lane.b32.xlu2 %v1206_v60, %s2068_s29 }
 0x853   : > { %1242 = vperm.xlu0 %2019, %v2664_v31   ;;  %1246 = vperm.xlu1 %2020, %v2708_v20  }
 0x85b   : > { %2021 = vset.pattern.permute.xlu0 %v2090_v44  ;;  %2022 = vset.pattern.permute.xlu1 %v2090_v44 }
 0x89c   : > { %v1214_v62 = vpop.permute.xlu2 %1213 }
 0x8a4   : > { %v1218_v15 = vpop.permute.xlu2 %1217 }
 0x8a5   : > { %v1237_v35 = vadd.f32 %v1218_v15, %v1189_v5 }
 0x8ac   : > { %v2918_v10 = vpop.permute.xlu2 %1223 }
 0x8b4   : > { %v1216_v17 = vpop.permute.xlu1 %1215 }
 0x8b5   : > { %v1225_v49 = vsel %vm394_vm3, %v1214_v62, %v1216_v17  ;;  %v1226_v1 = vsel %vm394_vm3, %v1216_v17, %v1218_v15 }
 0x8b6   : > { %v1235_v4 = vadd.f32 %v1225_v49, %v1187_v25  ;;  %v1236_v47 = vadd.f32 %v1226_v1, %v1188_v36 }
 0x8bd   : > { %v1222_v3 = vpop.permute.xlu1 %1221  ;;  %v1220_v61 = vpop.permute.xlu0 %1219 }
 0x8be   : > { %v1228_v63 = vsel %vm394_vm3, %v1222_v3, %v2918_v10  ;;  %v1227_v43 = vsel %vm394_vm3, %v1220_v61, %v1222_v3 }
 0x8bf   : > { %v1239_v29 = vadd.f32 %v1228_v63, %v1191_v30  ;;  %v1238_v0 = vadd.f32 %v1227_v43, %v1190_v6 }
 0x8c5   : > { %v1247_v32 = vpop.permute.xlu1 %1246  ;;  %v1243_v53 = vpop.permute.xlu0 %1242 }
 0x8c6   : > { %v1252_v2 = vmul.f32 %v1247_v32, %v2687_v54  ;;  %v1249_v16 = vmul.f32 %v1243_v53, %v2687_v54  ;;  %v1250_v12 = vmul.f32 %v1243_v53, %v2689_v7  ;;  %v1251_v13 = vmul.f32 %v1243_v53, %v2691_v38 }
 0x8c7   : > { %v1253_v5 = vmul.f32 %v1247_v32, %v2689_v7  ;;  %v1254_v21 = vmul.f32 %v1247_v32, %v2691_v38 }
 0x8c8   : > { %1267 = vrot.lane.b32.xlu0 %v1252_v2, %s2069_s30  ;;  %1261 = vrot.lane.b32.xlu2 %v1249_v16, %s2069_s30 }
 0x8c9   : > { %1263 = vrot.lane.b32.xlu1 %v1250_v12, %s2069_s30 }
 0x8d0   : > { %1290 = vperm.xlu0 %2021, %v2664_v31   ;;  %1265 = vrot.lane.b32.xlu2 %v1251_v13, %s2069_s30 }
 0x8d1   : > { %1269 = vrot.lane.b32.xlu1 %v1253_v5, %s2069_s30 }
 0x8d8   : > { %1271 = vrot.lane.b32.xlu2 %v1254_v21, %s2069_s30  ;;  %2023 = vset.pattern.permute.xlu0 %v2091_v41 }
 0x8d9   : > { %1294 = vperm.xlu1 %2022, %v2708_v20  }
 0x8e1   : > { %2024 = vset.pattern.permute.xlu1 %v2091_v41 }
 0x922   : > { %v1262_v46 = vpop.permute.xlu2 %1261 }
 0x92a   : > { %v1266_v52 = vpop.permute.xlu2 %1265 }
 0x92b   : > { %v1285_v22 = vadd.f32 %v1266_v52, %v1237_v35 }
 0x932   : > { %v2939_v56 = vpop.permute.xlu2 %1271 }
 0x93a   : > { %v1268_v25 = vpop.permute.xlu0 %1267 }
 0x93b   : > { %v1264_v36 = vpop.permute.xlu1 %1263 }
 0x93c   : > { %v1273_v42 = vsel %vm443_vm4, %v1262_v46, %v1264_v36  ;;  %v1274_v39 = vsel %vm443_vm4, %v1264_v36, %v1266_v52 }
 0x93d   : > { %v1283_v19 = vadd.f32 %v1273_v42, %v1235_v4  ;;  %v1284_v9 = vadd.f32 %v1274_v39, %v1236_v47  ;;  %v2092_v47 = vmov 26  }
 0x942   : > { %v1291_v59 = vpop.permute.xlu0 %1290 }
 0x943   : > { %v1270_v6 = vpop.permute.xlu1 %1269  ;;  %v1297_v30 = vmul.f32 %v1291_v59, %v2687_v54  ;;  %v1298_v14 = vmul.f32 %v1291_v59, %v2689_v7  ;;  %v1299_v62 = vmul.f32 %v1291_v59, %v2691_v38  ;;  %v2094_v59 = vmov 28  }
 0x944   : > { %v1275_v33 = vsel %vm443_vm4, %v1268_v25, %v1270_v6  ;;  %v1276_v50 = vsel %vm443_vm4, %v1270_v6, %v2939_v56  ;;  %2029 = vset.pattern.permute.xlu2 %v2094_v59 }
 0x945   : > { %v1286_v23 = vadd.f32 %v1275_v33, %v1238_v0  ;;  %v1287_v60 = vadd.f32 %v1276_v50, %v1239_v29  ;;  %1311 = vrot.lane.b32.xlu1 %v1298_v14, %s2071_s4  ;;  %1309 = vrot.lane.b32.xlu2 %v1297_v30, %s2071_s4 }
 0x94b   : > { %v1295_v15 = vpop.permute.xlu1 %1294 }
 0x94c   : > { %v1300_v35 = vmul.f32 %v1295_v15, %v2687_v54  ;;  %v1301_v44 = vmul.f32 %v1295_v15, %v2689_v7  ;;  %v1302_v17 = vmul.f32 %v1295_v15, %v2691_v38 }
 0x94d   : > { %1313 = vrot.lane.b32.xlu2 %v1299_v62, %s2071_s4 }
 0x94e   : > { %1315 = vrot.lane.b32.xlu0 %v1300_v35, %s2071_s4  ;;  %1317 = vrot.lane.b32.xlu1 %v1301_v44, %s2071_s4 }
 0x955   : > { %1319 = vrot.lane.b32.xlu2 %v1302_v17, %s2071_s4 }
 0x956   : > { %1338 = vperm.xlu0 %2023, %v2664_v31   ;;  %1342 = vperm.xlu1 %2024, %v2708_v20  }
 0x95e   : > { %2025 = vset.pattern.permute.xlu0 %v2092_v47  ;;  %2026 = vset.pattern.permute.xlu1 %v2092_v47 }
 0x99f   : > { %v1310_v49 = vpop.permute.xlu2 %1309 }
 0x9a7   : > { %v1314_v1 = vpop.permute.xlu2 %1313 }
 0x9a8   : > { %v1333_v4 = vadd.f32 %v1314_v1, %v1285_v22 }
 0x9af   : > { %v2960_v0 = vpop.permute.xlu2 %1319 }
 0x9b7   : > { %v1312_v3 = vpop.permute.xlu1 %1311 }
 0x9b8   : > { %v1321_v61 = vsel %vm492_vm5, %v1310_v49, %v1312_v3  ;;  %v1322_v63 = vsel %vm492_vm5, %v1312_v3, %v1314_v1 }
 0x9b9   : > { %v1331_v43 = vadd.f32 %v1321_v61, %v1283_v19  ;;  %v1332_v29 = vadd.f32 %v1322_v63, %v1284_v9  ;;  %v2093_v9 = vmov 27  }
 0x9c0   : > { %v1318_v32 = vpop.permute.xlu1 %1317  ;;  %v1316_v53 = vpop.permute.xlu0 %1315 }
 0x9c1   : > { %v1324_v2 = vsel %vm492_vm5, %v1318_v32, %v2960_v0  ;;  %v1323_v16 = vsel %vm492_vm5, %v1316_v53, %v1318_v32  ;;  %v3324_v32 = vld [vmem:[#allocation5_spill] sm:$0xff] }
 0x9c2   : > { %v1335_v12 = vadd.f32 %v1324_v2, %v1287_v60  ;;  %v1334_v13 = vadd.f32 %v1323_v16, %v1286_v23 }
 0x9c8   : > { %v1343_v5 = vpop.permute.xlu1 %1342  ;;  %v1339_v21 = vpop.permute.xlu0 %1338 }
 0x9c9   : > { %v1348_v46 = vmul.f32 %v1343_v5, %v2687_v54  ;;  %v1345_v52 = vmul.f32 %v1339_v21, %v2687_v54  ;;  %v1346_v22 = vmul.f32 %v1339_v21, %v2689_v7  ;;  %v1347_v41 = vmul.f32 %v1339_v21, %v2691_v38 }
 0x9ca   : > { %v1349_v25 = vmul.f32 %v1343_v5, %v2689_v7  ;;  %v1350_v36 = vmul.f32 %v1343_v5, %v2691_v38 }
 0x9cb   : > { %1363 = vrot.lane.b32.xlu0 %v1348_v46, %s2073_s5  ;;  %1357 = vrot.lane.b32.xlu2 %v1345_v52, %s2073_s5  ;;  %v629_v46 = vmul.f32 %v2382_v51, %v2398_v58  ;;  %v1042_v51 = vmul.f32 %v2691_v38, %v2828_v27 }
 0x9cc   : > { %1359 = vrot.lane.b32.xlu1 %v1346_v22, %s2073_s5  ;;  %v3325_v22 = vld [vmem:[#allocation24_spill] sm:$0xff] }
 0x9d3   : > { %1386 = vperm.xlu0 %2025, %v2664_v31   ;;  %1361 = vrot.lane.b32.xlu2 %v1347_v41, %s2073_s5  ;;  %v3326_v41 = vld [vmem:[#allocation25_spill] sm:$0xff] }
 0x9d4   : > { %1365 = vrot.lane.b32.xlu1 %v1349_v25, %s2073_s5  ;;  %v3327_v25 = vld [vmem:[#allocation26_spill] sm:$0xff] }
 0x9db   : > { %1367 = vrot.lane.b32.xlu2 %v1350_v36, %s2073_s5  ;;  %2027 = vset.pattern.permute.xlu0 %v2093_v9  ;;  %v3328_v36 = vld [vmem:[#allocation27_spill] sm:$0xff] }
 0x9dc   : > { %1390 = vperm.xlu1 %2026, %v2708_v20  }
 0x9e4   : > { %2028 = vset.pattern.permute.xlu1 %v2093_v9 }
 0xa25   : > { %v1358_v42 = vpop.permute.xlu2 %1357 }
 0xa2d   : > { %v1362_v39 = vpop.permute.xlu2 %1361 }
 0xa2e   : > { %v2979_v19 = vadd.f32 %v1362_v39, %v1333_v4 }
 0xa35   : > { %v1368_v62 = vpop.permute.xlu2 %1367 }
 0xa3d   : > { %v1364_v6 = vpop.permute.xlu0 %1363 }
 0xa3e   : > { %v1360_v30 = vpop.permute.xlu1 %1359 }
 0xa3f   : > { %v1369_v14 = vsel %vm541_vm6, %v1358_v42, %v1360_v30  ;;  %v1370_v33 = vsel %vm541_vm6, %v1360_v30, %v1362_v39  ;;  %v3329_v42 = vld [vmem:[#allocation28_spill] sm:$0xff]  ;;  %v3330_v39 = vld [vmem:[#allocation29_spill] sm:$0xff] }
 0xa40   : > { %v2983_v50 = vadd.f32 %v1369_v14, %v1331_v43  ;;  %v2985_v23 = vadd.f32 %v1370_v33, %v1332_v29 }
 0xa45   : > { %v1387_v60 = vpop.permute.xlu0 %1386 }
 0xa46   : > { %v1366_v15 = vpop.permute.xlu1 %1365  ;;  %v1393_v35 = vmul.f32 %v1387_v60, %v2687_v54  ;;  %v1394_v44 = vmul.f32 %v1387_v60, %v2689_v7  ;;  %v1395_v47 = vmul.f32 %v1387_v60, %v2691_v38 }
 0xa47   : > { %v1371_v17 = vsel %vm541_vm6, %v1364_v6, %v1366_v15  ;;  %v1372_v49 = vsel %vm541_vm6, %v1366_v15, %v1368_v62 }
 0xa48   : > { %v2991_v1 = vadd.f32 %v1371_v17, %v1334_v13  ;;  %v2993_v4 = vadd.f32 %v1372_v49, %v1335_v12  ;;  %1407 = vrot.lane.b32.xlu1 %v1394_v44, %s2076_s6  ;;  %1405 = vrot.lane.b32.xlu2 %v1393_v35, %s2076_s6  ;;  %v1917_v17 = vld [vmem:[%s2168_s25 + $0x3] ss:$4 sm:$0x7] }
 0xa49   : > { %v3040_v49 = vperm.slane %v1917_v17, 0 }
 0xa4e   : > { %v1391_v3 = vpop.permute.xlu1 %1390 }
 0xa4f   : > { %v1396_v61 = vmul.f32 %v1391_v3, %v2687_v54  ;;  %v1397_v63 = vmul.f32 %v1391_v3, %v2689_v7  ;;  %v1398_v43 = vmul.f32 %v1391_v3, %v2691_v38  ;;  %v3323_v54 = vld [vmem:[#allocation2_spill] sm:$0xff] }
 0xa50   : > { %1409 = vrot.lane.b32.xlu2 %v1395_v47, %s2076_s6  ;;  %v208_v7 = vmul.f32 %v2171_v11, %v3323_v54 }
 0xa51   : > { %1411 = vrot.lane.b32.xlu0 %v1396_v61, %s2076_s6  ;;  %1413 = vrot.lane.b32.xlu1 %v1397_v63, %s2076_s6 }
 0xa52   : > { %v214_v29 = vadd.f32 %v208_v7, %v2193_v24 }
 0xa54   : > { %v263_v53 = vadd.f32 %v3324_v32, %v214_v29 }
 0xa56   : > { %v312_v2 = vadd.f32 %v2321_v45, %v263_v53 }
 0xa58   : > { %1415 = vrot.lane.b32.xlu2 %v1398_v43, %s2076_s6  ;;  %v361_v16 = vadd.f32 %v2327_v48, %v312_v2 }
 0xa59   : > { %1436 = vperm.xlu0 %2027, %v2664_v31   ;;  %1440 = vperm.xlu1 %2028, %v2708_v20  }
 0xa5a   : > { %v410_v12 = vadd.f32 %v2339_v57, %v361_v16 }
 0xa5c   : > { %v459_v13 = vadd.f32 %v2361_v28, %v410_v12 }
 0xa5e   : > { %v508_v5 = vadd.f32 %v2367_v34, %v459_v13 }
 0xa60   : > { %1463 = vperm.xlu2 %2029, %v2664_v31   ;;  %v557_v21 = vadd.f32 %v2373_v37, %v508_v5 }
 0xa61   : > { %2030 = vset.pattern.permute.xlu1 %v2094_v59 }
 0xa62   : > { %1467 = vperm.xlu1 %2030, %v2708_v20   ;;  %v606_v11 = vadd.f32 %v2379_v40, %v557_v21  ;;  %v3331_v40 = vld [vmem:[#allocation30_spill] sm:$0xff] }
 0xa64   : > { %v635_v24 = vadd.f32 %v629_v46, %v606_v11 }
 0xa66   : > { %v683_v52 = vadd.f32 %v2456_v26, %v635_v24 }
 0xa68   : > { %v731_v45 = vadd.f32 %v3325_v22, %v683_v52 }
 0xa6a   : > { %v779_v48 = vadd.f32 %v3326_v41, %v731_v45 }
 0xa6c   : > { %v827_v57 = vadd.f32 %v3327_v25, %v779_v48 }
 0xa6e   : > { %v875_v28 = vadd.f32 %v3328_v36, %v827_v57 }
 0xa70   : > { %v923_v34 = vadd.f32 %v3329_v42, %v875_v28 }
 0xa72   : > { %v971_v37 = vadd.f32 %v3330_v39, %v923_v34 }
 0xa74   : > { %v1019_v58 = vadd.f32 %v3331_v40, %v971_v37  ;;  %v2096_v40 = vmov 30  }
 0xa76   : > { %v1048_v26 = vadd.f32 %v1042_v51, %v1019_v58 }
 0xa78   : > { %v1096_v59 = vadd.f32 %v2854_v55, %v1048_v26  ;;  %v3042_v55 = vperm.slane %v1917_v17, 1 }
 0xa7a   : > { %v1144_v6 = vadd.f32 %v2876_v8, %v1096_v59  ;;  %v3044_v8 = vperm.slane %v1917_v17, 2 }
 0xa7c   : > { %v1192_v30 = vadd.f32 %v2897_v18, %v1144_v6  ;;  %v2095_v18 = vmov 29  }
 0xa7d   : > { %2032 = vset.pattern.permute.xlu0 %v2095_v18  ;;  %2031 = vset.pattern.permute.xlu2 %v2095_v18 }
 0xa7e   : > { %v1240_v33 = vadd.f32 %v2918_v10, %v1192_v30 }
 0xa80   : > { %v1288_v15 = vadd.f32 %v2939_v56, %v1240_v33 }
 0xa82   : > { %v1336_v35 = vadd.f32 %v2960_v0, %v1288_v15 }
 0xa84   : > { %v1384_v38 = vadd.f32 %v1368_v62, %v1336_v35 }
 0xaa2   : > { %v1406_v9 = vpop.permute.xlu2 %1405 }
 0xaaa   : > { %v1410_v14 = vpop.permute.xlu2 %1409 }
 0xaab   : > { %v1429_v60 = vadd.f32 %v1410_v14, %v2979_v19 }
 0xab2   : > { %v1416_v27 = vpop.permute.xlu2 %1415 }
 0xab3   : > { %v1432_v44 = vadd.f32 %v1416_v27, %v1384_v38 }
 0xaba   : > { %v1408_v10 = vpop.permute.xlu1 %1407  ;;  %v1464_v47 = vpop.permute.xlu2 %1463 }
 0xabb   : > { %v1417_v19 = vsel %vm590_vm7, %v1406_v9, %v1408_v10  ;;  %v1418_v56 = vsel %vm590_vm7, %v1408_v10, %v1410_v14  ;;  %v1470_v0 = vmul.f32 %v1464_v47, %v3040_v49  ;;  %v1471_v62 = vmul.f32 %v1464_v47, %v3042_v55 }
 0xabc   : > { %v1427_v3 = vadd.f32 %v1417_v19, %v2983_v50  ;;  %v1428_v61 = vadd.f32 %v1418_v56, %v2985_v23  ;;  %v1472_v63 = vmul.f32 %v1464_v47, %v3044_v8  ;;  %v2097_v56 = vmov 31  }
 0xabd   : > { %1484 = vrot.lane.b32.xlu0 %v1471_v62, %s2064_s26  ;;  %1482 = vrot.lane.b32.xlu2 %v1470_v0, %s2064_s26 }
 0xabe   : > { %1486 = vrot.lane.b32.xlu1 %v1472_v63, %s2064_s26 }
 0xac3   : > { %v1414_v43 = vpop.permute.xlu1 %1413  ;;  %v1412_v54 = vpop.permute.xlu0 %1411 }
 0xac4   : > { %v1420_v7 = vsel %vm590_vm7, %v1414_v43, %v1416_v27  ;;  %v1419_v29 = vsel %vm590_vm7, %v1412_v54, %v1414_v43 }
 0xac5   : > { %v1431_v32 = vadd.f32 %v1420_v7, %v2993_v4  ;;  %v1430_v50 = vadd.f32 %v1419_v29, %v2991_v1 }
 0xacb   : > { %v1441_v53 = vpop.permute.xlu1 %1440  ;;  %v1437_v1 = vpop.permute.xlu0 %1436 }
 0xacc   : > { %v1453_v23 = vmul.f32 %v3040_v49, %v1441_v53  ;;  %v1454_v2 = vmul.f32 %v3042_v55, %v1441_v53  ;;  %v1455_v16 = vmul.f32 %v3044_v8, %v1441_v53  ;;  %v1450_v52 = vmul.f32 %v3040_v49, %v1437_v1 }
 0xacd   : > { %v1452_v22 = vmul.f32 %v3044_v8, %v1437_v1  ;;  %v1451_v45 = vmul.f32 %v3042_v55, %v1437_v1 }
 0xace   : > { %v3063_v12 = vadd.f32 %v1455_v16, %v1432_v44  ;;  %v1460_v13 = vadd.f32 %v1454_v2, %v1431_v32  ;;  %v1459_v5 = vadd.f32 %v1453_v23, %v1430_v50  ;;  %v1456_v25 = vadd.f32 %v1450_v52, %v1427_v3 }
 0xacf   : > { %v1458_v41 = vadd.f32 %v1452_v22, %v1429_v60  ;;  %v1457_v36 = vadd.f32 %v1451_v45, %v1428_v61  ;;  %v2098_v52 = vmov 32  }
 0xad4   : > { %v1468_v21 = vpop.permute.xlu1 %1467 }
 0xad5   : > { %v1473_v46 = vmul.f32 %v1468_v21, %v3040_v49  ;;  %v1474_v11 = vmul.f32 %v1468_v21, %v3042_v55  ;;  %v1475_v4 = vmul.f32 %v1468_v21, %v3044_v8  ;;  %v3120_v21 = vld [vmem:[%s3248_s0] sm:$0xff] }
 0xad7   : > { %1492 = vrot.lane.b32.xlu1 %v1475_v4, %s2064_s26  ;;  %1490 = vrot.lane.b32.xlu0 %v1474_v11, %s2064_s26 }
 0xad8   : > { %1488 = vrot.lane.b32.xlu2 %v1473_v46, %s2064_s26 }
 0xadf   : > { %1515 = vperm.xlu0 %2032, %v2708_v20  }
 0xae0   : > { %1511 = vperm.xlu2 %2031, %v2664_v31  }
 0xae7   : > { %2034 = vset.pattern.permute.xlu0 %v2096_v40 }
 0xae8   : > { %2033 = vset.pattern.permute.xlu2 %v2096_v40 }
 0xb17   : > { %v1483_v24 = vpop.permute.xlu2 %1482 }
 0xb2f   : > { %v1485_v48 = vpop.permute.xlu0 %1484 }
 0xb30   : > { %v1487_v57 = vpop.permute.xlu1 %1486  ;;  %v1494_v28 = vsel %vm247_vm0, %v1483_v24, %v1485_v48 }
 0xb31   : > { %v1506_v42 = vadd.f32 %v1487_v57, %v1458_v41  ;;  %v1495_v34 = vsel %vm247_vm0, %v1485_v48, %v1487_v57  ;;  %v1504_v39 = vadd.f32 %v1494_v28, %v1456_v25 }
 0xb32   : > { %v1505_v37 = vadd.f32 %v1495_v34, %v1457_v36  ;;  %v1489_v51 = vpop.permute.xlu2 %1488 }
 0xb3a   : > { %v1512_v58 = vpop.permute.xlu2 %1511 }
 0xb3b   : > { %v1518_v9 = vmul.f32 %v1512_v58, %v3040_v49  ;;  %v1519_v26 = vmul.f32 %v1512_v58, %v3042_v55  ;;  %v1520_v59 = vmul.f32 %v1512_v58, %v3044_v8 }
 0xb3d   : > { %1530 = vrot.lane.b32.xlu1 %v1518_v9, %s2065_s27  ;;  %1532 = vrot.lane.b32.xlu2 %v1519_v26, %s2065_s27 }
 0xb45   : > { %1534 = vrot.lane.b32.xlu1 %v1520_v59, %s2065_s27  ;;  %v2049_v59 = vld [vmem:[%s3248_s0 + $0x8] sm:$0xff] }
 0xb49   : > { %v3084_v6 = vpop.permute.xlu1 %1492  ;;  %v1491_v30 = vpop.permute.xlu0 %1490 }
 0xb4a   : > { %v1496_v14 = vsel %vm247_vm0, %v1489_v51, %v1491_v30  ;;  %v1497_v33 = vsel %vm247_vm0, %v1491_v30, %v3084_v6 }
 0xb4b   : > { %v1507_v60 = vadd.f32 %v1496_v14, %v1459_v5  ;;  %v1508_v15 = vadd.f32 %v1497_v33, %v1460_v13 }
 0xb51   : > { %v1516_v35 = vpop.permute.xlu0 %1515 }
 0xb52   : > { %v1521_v38 = vmul.f32 %v1516_v35, %v3040_v49  ;;  %v1522_v27 = vmul.f32 %v1516_v35, %v3042_v55  ;;  %v1523_v44 = vmul.f32 %v1516_v35, %v3044_v8  ;;  %v2099_v35 = vmov 33  }
 0xb54   : > { %1540 = vrot.lane.b32.xlu1 %v1523_v44, %s2065_s27  ;;  %1538 = vrot.lane.b32.xlu0 %v1522_v27, %s2065_s27 }
 0xb55   : > { %1536 = vrot.lane.b32.xlu2 %v1521_v38, %s2065_s27 }
 0xb5c   : > { %1563 = vperm.xlu0 %2034, %v2708_v20  }
 0xb5d   : > { %1559 = vperm.xlu2 %2033, %v2664_v31  }
 0xb64   : > { %2036 = vset.pattern.permute.xlu0 %v2097_v56 }
 0xb65   : > { %2035 = vset.pattern.permute.xlu2 %v2097_v56 }
 0xb97   : > { %v1533_v17 = vpop.permute.xlu2 %1532 }
 0xbaf   : > { %v1531_v18 = vpop.permute.xlu1 %1530  ;;  %v1537_v10 = vpop.permute.xlu2 %1536 }
 0xbb0   : > { %v1542_v47 = vsel %vm296_vm1, %v1531_v18, %v1533_v17 }
 0xbb1   : > { %v1552_v19 = vadd.f32 %v1542_v47, %v1504_v39 }
 0xbb7   : > { %v1535_v0 = vpop.permute.xlu1 %1534  ;;  %v1560_v62 = vpop.permute.xlu2 %1559 }
 0xbb8   : > { %v1543_v3 = vsel %vm296_vm1, %v1533_v17, %v1535_v0  ;;  %v1554_v61 = vadd.f32 %v1535_v0, %v1506_v42  ;;  %v1566_v63 = vmul.f32 %v1560_v62, %v3040_v49  ;;  %v1567_v43 = vmul.f32 %v1560_v62, %v3042_v55 }
 0xbb9   : > { %v1553_v54 = vadd.f32 %v1543_v3, %v1505_v37  ;;  %v1568_v31 = vmul.f32 %v1560_v62, %v3044_v8 }
 0xbba   : > { %1578 = vrot.lane.b32.xlu1 %v1566_v63, %s2067_s28  ;;  %1580 = vrot.lane.b32.xlu2 %v1567_v43, %s2067_s28 }
 0xbc2   : > { %1582 = vrot.lane.b32.xlu1 %v1568_v31, %s2067_s28 }
 0xbc6   : > { %v3105_v7 = vpop.permute.xlu1 %1540  ;;  %v1539_v29 = vpop.permute.xlu0 %1538 }
 0xbc7   : > { %v1544_v32 = vsel %vm296_vm1, %v1537_v10, %v1539_v29  ;;  %v1545_v50 = vsel %vm296_vm1, %v1539_v29, %v3105_v7 }
 0xbc8   : > { %v1555_v53 = vadd.f32 %v1544_v32, %v1507_v60  ;;  %v1556_v23 = vadd.f32 %v1545_v50, %v1508_v15  ;;  %v2101_v50 = vmov 35  }
 0xbce   : > { %v1564_v2 = vpop.permute.xlu0 %1563 }
 0xbcf   : > { %v1569_v16 = vmul.f32 %v1564_v2, %v3040_v49  ;;  %v1570_v13 = vmul.f32 %v1564_v2, %v3042_v55  ;;  %v1571_v5 = vmul.f32 %v1564_v2, %v3044_v8 }
 0xbd1   : > { %1586 = vrot.lane.b32.xlu0 %v1570_v13, %s2067_s28  ;;  %1584 = vrot.lane.b32.xlu2 %v1569_v16, %s2067_s28 }
 0xbd2   : > { %1588 = vrot.lane.b32.xlu1 %v1571_v5, %s2067_s28 }
 0xbd9   : > { %1611 = vperm.xlu0 %2036, %v2708_v20   ;;  %1607 = vperm.xlu2 %2035, %v3120_v21  }
 0xbe1   : > { %2038 = vset.pattern.permute.xlu0 %v2098_v52  ;;  %2037 = vset.pattern.permute.xlu2 %v2098_v52 }
 0xc14   : > { %v1581_v46 = vpop.permute.xlu2 %1580 }
 0xc2b   : > { %v1585_v11 = vpop.permute.xlu2 %1584 }
 0xc2c   : > { %v1579_v4 = vpop.permute.xlu1 %1578 }
 0xc2d   : > { %v1590_v1 = vsel %vm345_vm2, %v1579_v4, %v1581_v46 }
 0xc2e   : > { %v1600_v24 = vadd.f32 %v1590_v1, %v1552_v19  ;;  %v2100_v19 = vmov 34  }
 0xc2f   : > { %2041 = vset.pattern.permute.xlu1 %v2100_v19 }
 0xc33   : > { %v1608_v22 = vpop.permute.xlu2 %1607 }
 0xc34   : > { %v1614_v45 = vmul.f32 %v1608_v22, %v3040_v49  ;;  %v1615_v20 = vmul.f32 %v1608_v22, %v3042_v55  ;;  %v1583_v41 = vpop.permute.xlu1 %1582  ;;  %v1616_v36 = vmul.f32 %v1608_v22, %v3044_v8  ;;  %v1509_v22 = vadd.f32 %v3084_v6, %v3063_v12 }
 0xc35   : > { %v1591_v48 = vsel %vm345_vm2, %v1581_v46, %v1583_v41  ;;  %v1602_v25 = vadd.f32 %v1583_v41, %v1554_v61 }
 0xc36   : > { %v1601_v57 = vadd.f32 %v1591_v48, %v1553_v54  ;;  %1626 = vrot.lane.b32.xlu1 %v1614_v45, %s2068_s29  ;;  %1628 = vrot.lane.b32.xlu2 %v1615_v20, %s2068_s29  ;;  %v1557_v45 = vadd.f32 %v3105_v7, %v1509_v22 }
 0xc3e   : > { %1630 = vrot.lane.b32.xlu1 %v1616_v36, %s2068_s29 }
 0xc43   : > { %v1587_v28 = vpop.permute.xlu0 %1586 }
 0xc44   : > { %v1592_v42 = vsel %vm345_vm2, %v1585_v11, %v1587_v28  ;;  %v3132_v34 = vpop.permute.xlu1 %1588 }
 0xc45   : > { %v1603_v39 = vadd.f32 %v1592_v42, %v1555_v53  ;;  %v1593_v37 = vsel %vm345_vm2, %v1587_v28, %v3132_v34  ;;  %v1605_v20 = vadd.f32 %v3132_v34, %v1557_v45 }
 0xc46   : > { %v1604_v51 = vadd.f32 %v1593_v37, %v1556_v23 }
 0xc4b   : > { %v1612_v40 = vpop.permute.xlu0 %1611 }
 0xc4c   : > { %v1617_v58 = vmul.f32 %v1612_v40, %v3040_v49  ;;  %v1618_v9 = vmul.f32 %v1612_v40, %v3042_v55  ;;  %v1619_v26 = vmul.f32 %v1612_v40, %v3044_v8 }
 0xc4e   : > { %1634 = vrot.lane.b32.xlu0 %v1618_v9, %s2068_s29  ;;  %1632 = vrot.lane.b32.xlu2 %v1617_v58, %s2068_s29 }
 0xc4f   : > { %1636 = vrot.lane.b32.xlu1 %v1619_v26, %s2068_s29 }
 0xc56   : > { %1659 = vperm.xlu0 %2038, %v2049_v59   ;;  %1655 = vperm.xlu2 %2037, %v3120_v21  }
 0xc5e   : > { %2040 = vset.pattern.permute.xlu0 %v2099_v35  ;;  %2039 = vset.pattern.permute.xlu2 %v2099_v35 }
 0xc90   : > { %v1629_v30 = vpop.permute.xlu2 %1628 }
 0xca8   : > { %v1633_v14 = vpop.permute.xlu2 %1632  ;;  %v1627_v33 = vpop.permute.xlu1 %1626 }
 0xca9   : > { %v1638_v60 = vsel %vm394_vm3, %v1627_v33, %v1629_v30 }
 0xcaa   : > { %v1648_v15 = vadd.f32 %v1638_v60, %v1600_v24 }
 0xcb0   : > { %v1656_v38 = vpop.permute.xlu2 %1655  ;;  %v1631_v27 = vpop.permute.xlu1 %1630 }
 0xcb1   : > { %v1662_v44 = vmul.f32 %v1656_v38, %v3040_v49  ;;  %v1663_v17 = vmul.f32 %v1656_v38, %v3042_v55  ;;  %v1639_v18 = vsel %vm394_vm3, %v1629_v30, %v1631_v27  ;;  %v1650_v47 = vadd.f32 %v1631_v27, %v1602_v25 }
 0xcb2   : > { %v1649_v10 = vadd.f32 %v1639_v18, %v1601_v57  ;;  %v1664_v56 = vmul.f32 %v1656_v38, %v3044_v8 }
 0xcb3   : > { %1674 = vrot.lane.b32.xlu1 %v1662_v44, %s2069_s30  ;;  %1676 = vrot.lane.b32.xlu2 %v1663_v17, %s2069_s30 }
 0xcbb   : > { %1678 = vrot.lane.b32.xlu1 %v1664_v56, %s2069_s30 }
 0xcc0   : > { %v1635_v0 = vpop.permute.xlu0 %1634 }
 0xcc1   : > { %v1640_v62 = vsel %vm394_vm3, %v1633_v14, %v1635_v0  ;;  %v1637_v3 = vpop.permute.xlu1 %1636 }
 0xcc2   : > { %v1651_v61 = vadd.f32 %v1640_v62, %v1603_v39  ;;  %v1641_v63 = vsel %vm394_vm3, %v1635_v0, %v1637_v3  ;;  %v1653_v41 = vadd.f32 %v1637_v3, %v1605_v20 }
 0xcc3   : > { %v1652_v43 = vadd.f32 %v1641_v63, %v1604_v51 }
 0xcc8   : > { %v1660_v54 = vpop.permute.xlu0 %1659 }
 0xcc9   : > { %v1665_v31 = vmul.f32 %v1660_v54, %v3040_v49  ;;  %v1666_v29 = vmul.f32 %v1660_v54, %v3042_v55  ;;  %v1667_v32 = vmul.f32 %v1660_v54, %v3044_v8 }
 0xccb   : > { %1682 = vrot.lane.b32.xlu0 %v1666_v29, %s2069_s30  ;;  %1680 = vrot.lane.b32.xlu2 %v1665_v31, %s2069_s30 }
 0xccc   : > { %1684 = vrot.lane.b32.xlu1 %v1667_v32, %s2069_s30 }
 0xcd3   : > { %1707 = vperm.xlu0 %2040, %v2049_v59   ;;  %1703 = vperm.xlu2 %2039, %v3120_v21  }
 0xcd4   : > { %1751 = vperm.xlu1 %2041, %v3120_v21  }
 0xcdb   : > { %2042 = vset.pattern.permute.xlu2 %v2100_v19  ;;  %2045 = vset.pattern.permute.xlu0 %v2101_v50 }
 0xcdc   : > { %2043 = vset.pattern.permute.xlu1 %v2101_v50  ;;  %1755 = vperm.xlu2 %2042, %v2049_v59  }
 0xcdd   : > { %1799 = vperm.xlu1 %2043, %v3120_v21  }
 0xce4   : > { %2044 = vset.pattern.permute.xlu2 %v2101_v50 }
 0xce5   : > { %1803 = vperm.xlu2 %2044, %v2049_v59  }
 0xd0d   : > { %v1677_v53 = vpop.permute.xlu2 %1676 }
 0xd25   : > { %v1681_v23 = vpop.permute.xlu2 %1680  ;;  %v1675_v2 = vpop.permute.xlu1 %1674 }
 0xd26   : > { %v1686_v16 = vsel %vm443_vm4, %v1675_v2, %v1677_v53 }
 0xd27   : > { %v3166_v13 = vadd.f32 %v1686_v16, %v1648_v15 }
 0xd2d   : > { %v1704_v5 = vpop.permute.xlu2 %1703  ;;  %v1679_v46 = vpop.permute.xlu1 %1678 }
 0xd2e   : > { %v1710_v11 = vmul.f32 %v1704_v5, %v3040_v49  ;;  %v1711_v4 = vmul.f32 %v1704_v5, %v3042_v55  ;;  %v1712_v1 = vmul.f32 %v1704_v5, %v3044_v8  ;;  %v1687_v24 = vsel %vm443_vm4, %v1677_v53, %v1679_v46 }
 0xd2f   : > { %v3172_v21 = vadd.f32 %v1687_v24, %v1649_v10  ;;  %v1698_v52 = vadd.f32 %v1679_v46, %v1650_v47 }
 0xd30   : > { %1726 = vrot.lane.b32.xlu2 %v1712_v1, %s2071_s4  ;;  %1722 = vrot.lane.b32.xlu0 %v1710_v11, %s2071_s4 }
 0xd31   : > { %1724 = vrot.lane.b32.xlu1 %v1711_v4, %s2071_s4 }
 0xd36   : > { %v1756_v9 = vpop.permute.xlu2 %1755 }
 0xd37   : > { %v1761_v26 = vmul.f32 %v1756_v9, %v3040_v49  ;;  %v1763_v59 = vmul.f32 %v1756_v9, %v3044_v8  ;;  %v1762_v30 = vmul.f32 %v1756_v9, %v3042_v55 }
 0xd3d   : > { %v1683_v48 = vpop.permute.xlu0 %1682 }
 0xd3e   : > { %v1688_v25 = vsel %vm443_vm4, %v1681_v23, %v1683_v48  ;;  %v1685_v57 = vpop.permute.xlu1 %1684 }
 0xd3f   : > { %v3182_v36 = vadd.f32 %v1688_v25, %v1651_v61  ;;  %v1689_v28 = vsel %vm443_vm4, %v1683_v48, %v1685_v57  ;;  %v1701_v42 = vadd.f32 %v1685_v57, %v1653_v41  ;;  %v1804_v35 = vpop.permute.xlu2 %1803 }
 0xd40   : > { %v3185_v39 = vadd.f32 %v1689_v28, %v1652_v43  ;;  %v1809_v38 = vmul.f32 %v1804_v35, %v3040_v49  ;;  %v1811_v27 = vmul.f32 %v1804_v35, %v3044_v8  ;;  %v1810_v44 = vmul.f32 %v1804_v35, %v3042_v55 }
 0xd45   : > { %v1708_v37 = vpop.permute.xlu0 %1707 }
 0xd46   : > { %v1713_v51 = vmul.f32 %v1708_v37, %v3040_v49  ;;  %v1714_v12 = vmul.f32 %v1708_v37, %v3042_v55  ;;  %v1715_v6 = vmul.f32 %v1708_v37, %v3044_v8  ;;  %v1752_v7 = vpop.permute.xlu1 %1751 }
 0xd47   : > { %v1758_v34 = vmul.f32 %v1752_v7, %v3040_v49  ;;  %v1760_v40 = vmul.f32 %v1752_v7, %v3044_v8  ;;  %v1759_v58 = vmul.f32 %v1752_v7, %v3042_v55 }
 0xd48   : > { %1732 = vrot.lane.b32.xlu2 %v1715_v6, %s2071_s4  ;;  %1728 = vrot.lane.b32.xlu0 %v1713_v51, %s2071_s4 }
 0xd49   : > { %1730 = vrot.lane.b32.xlu1 %v1714_v12, %s2071_s4 }
 0xd4f   : > { %v1800_v14 = vpop.permute.xlu1 %1799 }
 0xd50   : > { %1774 = vrot.lane.b32.xlu2 %v1760_v40, %s2073_s5  ;;  %1770 = vrot.lane.b32.xlu0 %v1758_v34, %s2073_s5  ;;  %v1806_v33 = vmul.f32 %v1800_v14, %v3040_v49  ;;  %v1808_v60 = vmul.f32 %v1800_v14, %v3044_v8  ;;  %v1807_v15 = vmul.f32 %v1800_v14, %v3042_v55 }
 0xd51   : > { %1772 = vrot.lane.b32.xlu1 %v1759_v58, %s2073_s5 }
 0xd58   : > { %1780 = vrot.lane.b32.xlu2 %v1763_v59, %s2073_s5  ;;  %1776 = vrot.lane.b32.xlu0 %v1761_v26, %s2073_s5 }
 0xd59   : > { %1778 = vrot.lane.b32.xlu1 %v1762_v30, %s2073_s5 }
 0xd60   : > { %1822 = vrot.lane.b32.xlu2 %v1808_v60, %s2076_s6  ;;  %1818 = vrot.lane.b32.xlu0 %v1806_v33, %s2076_s6 }
 0xd61   : > { %1820 = vrot.lane.b32.xlu1 %v1807_v15, %s2076_s6 }
 0xd68   : > { %1828 = vrot.lane.b32.xlu2 %v1811_v27, %s2076_s6  ;;  %1824 = vrot.lane.b32.xlu0 %v1809_v38, %s2076_s6 }
 0xd69   : > { %1826 = vrot.lane.b32.xlu1 %v1810_v44, %s2076_s6 }
 0xd8a   : > { %v1727_v17 = vpop.permute.xlu2 %1726 }
 0xd8b   : > { %v1746_v0 = vadd.f32 %v1727_v17, %v1698_v52 }
 0xda2   : > { %v1733_v18 = vpop.permute.xlu2 %1732  ;;  %v1723_v47 = vpop.permute.xlu0 %1722 }
 0xda3   : > { %v1725_v56 = vpop.permute.xlu1 %1724  ;;  %v1749_v61 = vadd.f32 %v1733_v18, %v1701_v42 }
 0xda4   : > { %v1734_v53 = vsel %vm492_vm5, %v1723_v47, %v1725_v56  ;;  %v1735_v23 = vsel %vm492_vm5, %v1725_v56, %v1727_v17 }
 0xda5   : > { %v1744_v5 = vadd.f32 %v1734_v53, %v3166_v13  ;;  %v1745_v46 = vadd.f32 %v1735_v23, %v3172_v21 }
 0xdaa   : > { %v1775_v10 = vpop.permute.xlu2 %1774 }
 0xdab   : > { %v1794_v62 = vadd.f32 %v1775_v10, %v1746_v0 }
 0xdb2   : > { %v1781_v19 = vpop.permute.xlu2 %1780 }
 0xdb3   : > { %v1797_v63 = vadd.f32 %v1781_v19, %v1749_v61 }
 0xdba   : > { %v1729_v49 = vpop.permute.xlu0 %1728  ;;  %v1823_v55 = vpop.permute.xlu2 %1822 }
 0xdbb   : > { %v1842_v8 = vadd.f32 %v1823_v55, %v1794_v62  ;;  %v1731_v3 = vpop.permute.xlu1 %1730 }
 0xdbc   : > { %v1736_v41 = vsel %vm492_vm5, %v1729_v49, %v1731_v3  ;;  %v1737_v48 = vsel %vm492_vm5, %v1731_v3, %v1733_v18 }
 0xdbd   : > { %1849 = vst.msk [vmem:[%s3221_s20 + $0x10] sm:$0xff] %vm1848_vm8, %v1842_v8  ;;  %v1747_v25 = vadd.f32 %v1736_v41, %v3182_v36  ;;  %v1748_v57 = vadd.f32 %v1737_v48, %v3185_v39 }
 0xdc2   : > { %v1771_v43 = vpop.permute.xlu0 %1770  ;;  %v1829_v54 = vpop.permute.xlu2 %1828 }
 0xdc3   : > { %v1845_v31 = vadd.f32 %v1829_v54, %v1797_v63  ;;  %v1773_v29 = vpop.permute.xlu1 %1772 }
 0xdc4   : > { %v1782_v2 = vsel %vm541_vm6, %v1771_v43, %v1773_v29  ;;  %v1783_v16 = vsel %vm541_vm6, %v1773_v29, %v1775_v10 }
 0xdc5   : > { %1852 = vst.msk [vmem:[%s3221_s20 + $0x28] sm:$0xff] %vm1848_vm8, %v1845_v31  ;;  %v1792_v4 = vadd.f32 %v1782_v2, %v1744_v5  ;;  %v1793_v1 = vadd.f32 %v1783_v16, %v1745_v46 }
 0xdca   : > { %v1777_v32 = vpop.permute.xlu0 %1776 }
 0xdcb   : > { %v1779_v50 = vpop.permute.xlu1 %1778 }
 0xdcc   : > { %v1784_v13 = vsel %vm541_vm6, %v1777_v32, %v1779_v50  ;;  %v1785_v21 = vsel %vm541_vm6, %v1779_v50, %v1781_v19 }
 0xdcd   : > { %v1795_v42 = vadd.f32 %v1784_v13, %v1747_v25  ;;  %v1796_v37 = vadd.f32 %v1785_v21, %v1748_v57 }
 0xdd2   : > { %v1819_v11 = vpop.permute.xlu0 %1818 }
 0xdd3   : > { %v1821_v24 = vpop.permute.xlu1 %1820 }
 0xdd4   : > { %v1830_v52 = vsel %vm590_vm7, %v1819_v11, %v1821_v24  ;;  %v1831_v22 = vsel %vm590_vm7, %v1821_v24, %v1823_v55 }
 0xdd5   : > { %v1840_v45 = vadd.f32 %v1830_v52, %v1792_v4  ;;  %v1841_v20 = vadd.f32 %v1831_v22, %v1793_v1 }
 0xdd7   : > { %1846 = vst [vmem:[%s3221_s20] sm:$0xff] %v1840_v45 }
 0xdd8   : > { %1847 = vst [vmem:[%s3221_s20 + $0x8] sm:$0xff] %v1841_v20 }
 0xdda   : > { %v1825_v28 = vpop.permute.xlu0 %1824 }
 0xddb   : > { %v1827_v51 = vpop.permute.xlu1 %1826 }
 0xddc   : > { %v1832_v12 = vsel %vm590_vm7, %v1825_v28, %v1827_v51  ;;  %v1833_v6 = vsel %vm590_vm7, %v1827_v51, %v1829_v54 }
 0xddd   : > { %v1843_v7 = vadd.f32 %v1832_v12, %v1795_v42  ;;  %v1844_v34 = vadd.f32 %v1833_v6, %v1796_v37 }
 0xddf   : > { %1850 = vst [vmem:[%s3221_s20 + $0x18] sm:$0xff] %v1843_v7 }
 0xde0   : > { %1851 = vst [vmem:[%s3221_s20 + $0x20] sm:$0xff] %v1844_v34 }
 0xde1 PF: > { %s13_s12 = sadd.s32 1, %s2056_s12  }
 0xde2   : > { %p10_p4 = scmp.ge.s32.totalorder %s13_s12, 4  }
 0xde4   :  { %12 = sbr.rel (!%p10_p4) target bundleno = 1 (0x1), region = 65 }

</bundles_post_ra>
